<compile_context>
chip_gen: v5e
topology: v5e:2x2
jax: 0.10.0
libtpu: 0.0.40
codegen_flags: <defaults>
</compile_context>

<pallas_src>
import math
import functools

import jax
import jax.numpy as jnp
from jax.experimental import pallas as pl
from jax.experimental.pallas import tpu as pltpu


def attention_block_kernel(x_ref, pavg_ref, wqkv_ref, bqkv_ref, wo_ref, bo_ref,
                           gng_ref, gnb_ref, lng_ref, lnb_ref, out_ref, *,
                           num_heads, head_dim, eps, inv_rescale):
    x = x_ref[...].astype(jnp.float32)               # (nB, T, C)
    nB, T, C = x.shape
    d = head_dim

    # ---------------- GroupNorm (two-pass; per batch element) ----------------
    # pavg[c, c'] = 1/(T*cg) if c, c' share a group else 0, so one MXU matmul
    # broadcasts the per-group mean / variance back to every channel.
    pavg = pavg_ref[...]                             # (C, C) f32
    s1 = jnp.sum(x, axis=1)                          # (nB, C)
    mean_c = jnp.dot(s1, pavg, preferred_element_type=jnp.float32)   # (nB, C)
    xc = x - mean_c[:, None, :]
    s2 = jnp.sum(xc * xc, axis=1)                    # (nB, C)
    var_c = jnp.dot(s2, pavg, preferred_element_type=jnp.float32)
    inv_std = jax.lax.rsqrt(var_c + eps)
    xn = xc * inv_std[:, None, :] * gng_ref[...] + gnb_ref[...]       # (nB, T, C)

    # ---------------- Fused QKV projection (bf16 in, f32 accumulate) ---------
    xn_bf = xn.reshape(nB * T, C).astype(jnp.bfloat16)
    qkv = (jnp.dot(xn_bf, wqkv_ref[...], preferred_element_type=jnp.float32)
           + bqkv_ref[...])                          # (nB*T, 3C); q pre-scaled
    qkv_bf = qkv.reshape(nB, T, 3 * C).astype(jnp.bfloat16)

    wo = wo_ref[...]                                 # (C, C) bf16
    wo_heads = [wo[h * d:(h + 1) * d, :] for h in range(num_heads)]
    bo = jnp.broadcast_to(bo_ref[...], (T, C))       # hoisted broadcasts
    gamma = jnp.broadcast_to(lng_ref[...], (T, C))
    beta = jnp.broadcast_to(lnb_ref[...], (T, C))

    # TODO(synk): for realistic diffusion sizes (T up to 4096, C ~ 512) tile the
    # KV axis with online softmax instead of materializing the (T, T) scores; a
    # single f32 (T, T) tile alone exceeds v7x's 64 MiB VMEM.
    for b in range(nB):
        o_b = jnp.zeros((T, C), jnp.float32)
        for h in range(num_heads):
            qh = qkv_bf[b, :, h * d:(h + 1) * d]                    # (T, d)
            kh = qkv_bf[b, :, C + h * d:C + (h + 1) * d]
            vh = qkv_bf[b, :, 2 * C + h * d:2 * C + (h + 1) * d]
            scores = jax.lax.dot_general(
                qh, kh, (((1,), (1,)), ((), ())),
                preferred_element_type=jnp.float32)                 # (T, T) f32
            smax = jnp.max(scores, axis=-1, keepdims=True)
            p = jnp.exp(scores - smax)
            denom = jnp.sum(p, axis=-1, keepdims=True)
            p = p * pl.reciprocal(denom, approx=True)
            ctx = jnp.dot(p.astype(jnp.bfloat16), vh,
                          preferred_element_type=jnp.float32)       # (T, d)
            # accumulate output projection per head -> no lane-axis concatenate
            o_b = o_b + jnp.dot(ctx.astype(jnp.bfloat16), wo_heads[h],
                                preferred_element_type=jnp.float32)
        o_b = o_b + bo

        # LayerNorm over channels (dropout is identity: eval / p irrelevant)
        mu = jnp.mean(o_b, axis=-1, keepdims=True)
        var = jnp.mean((o_b - mu) ** 2, axis=-1, keepdims=True)
        y = (o_b - mu) * jax.lax.rsqrt(var + eps) * gamma + beta

        # Residual + rescale (precomputed 1/rescale multiply)
        out_ref[b] = ((y + x[b]) * inv_rescale).astype(out_ref.dtype)


def attention_block(x, params, *, num_groups, num_heads, eps, rescale):
    B, C, H, W = x.shape
    T = H * W
    G = num_groups
    cg = C // G
    d = C // num_heads

    # tokens-major layout: (B, T, C), channels on the lane axis
    x_tc = jnp.transpose(x, (0, 2, 3, 1)).reshape(B, T, C)

    # group-average matrix: P[c, c'] = 1/(T*cg) if c, c' share a group else 0
    onehot = jax.nn.one_hot(jnp.arange(C) // cg, G, dtype=jnp.float32)   # (C, G)
    pavg = (onehot @ onehot.T) / float(T * cg)                           # (C, C)

    scale = 1.0 / math.sqrt(math.sqrt(C / num_heads))

    # fused QKV weight / bias with the attention scale folded into the Q block;
    # weights stored bf16 for the MXU, biases stay f32 (added post-accumulation)
    wqkv = jnp.concatenate(
        [params["wq_t"] * scale, params["wk_t"], params["wv_t"]],
        axis=1).astype(jnp.bfloat16)                                     # (C, 3C)
    bqkv = jnp.concatenate(
        [params["bq"] * scale, params["bk"], params["bv"]]).reshape(1, 3 * C)
    wo = params["wo_t"].astype(jnp.bfloat16)                             # (C, C)
    bo = params["bo"].reshape(1, C)

    # batch blocking: largest nB (<=16) dividing B that keeps grid length >= 2
    # (so v7x's two TensorCores both get work); nB=1 falls out for tiny B.
    nB = 1
    for cand in range(min(B, 16), 0, -1):
        if B % cand == 0 and B // cand >= 2:
            nB = cand
            break

    kernel = functools.partial(
        attention_block_kernel, num_heads=num_heads, head_dim=d,
        eps=eps, inv_rescale=1.0 / rescale)

    def row(v):
        return v.reshape(1, C)

    def bcast2d(shape):
        return pl.BlockSpec(shape, lambda i: (0, 0))

    out = pl.pallas_call(
        kernel,
        out_shape=jax.ShapeDtypeStruct((B, T, C), x.dtype),
        grid=(B // nB,),
        in_specs=[
            pl.BlockSpec((nB, T, C), lambda i: (i, 0, 0)),   # x block of batches
            bcast2d((C, C)),          # group-average matrix P
            bcast2d((C, 3 * C)),      # fused Wqkv^T (bf16, q pre-scaled)
            bcast2d((1, 3 * C)),      # fused bias (f32)
            bcast2d((C, C)),          # Wo^T (bf16)
            bcast2d((1, C)),          # bo
            bcast2d((1, C)), bcast2d((1, C)),   # GroupNorm gamma / beta
            bcast2d((1, C)), bcast2d((1, C)),   # LayerNorm gamma / beta
        ],
        out_specs=pl.BlockSpec((nB, T, C), lambda i: (i, 0, 0)),
        compiler_params=pltpu.CompilerParams(dimension_semantics=("parallel",)),
    )(x_tc, pavg, wqkv, bqkv, wo, bo,
      row(params["gn_g"]), row(params["gn_b"]),
      row(params["ln_g"]), row(params["ln_b"]))

    return out.reshape(B, H, W, C).transpose(0, 3, 1, 2)


def reference(x, params, *, num_groups, num_heads, eps, rescale):
    """Pure-JAX f32 mirror of the PyTorch forward (scale applied to q only)."""
    B, C, H, W = x.shape
    xg = x.reshape(B, num_groups, C // num_groups, H, W)
    mean = xg.mean(axis=(2, 3, 4), keepdims=True)
    var = ((xg - mean) ** 2).mean(axis=(2, 3, 4), keepdims=True)
    xn = ((xg - mean) / jnp.sqrt(var + eps)).reshape(B, C, H, W)
    xn = xn * params["gn_g"][None, :, None, None] + params["gn_b"][None, :, None, None]
    h = xn.transpose(0, 2, 3, 1).reshape(B, H * W, C)
    q = h @ params["wq_t"] + params["bq"]
    k = h @ params["wk_t"] + params["bk"]
    v = h @ params["wv_t"] + params["bv"]
    d = C // num_heads

    def split(z):
        return z.reshape(B, H * W, num_heads, d).transpose(0, 2, 1, 3)

    q, k, v = split(q), split(k), split(v)
    scale = 1.0 / math.sqrt(math.sqrt(C / num_heads))
    scores = jnp.einsum('bhid,bhjd->bhij', q * scale, k)
    probs = jax.nn.softmax(scores.astype(jnp.float32), axis=-1)
    ctx = jnp.einsum('bhij,bhjd->bhid', probs, v)
    ctx = ctx.transpose(0, 2, 1, 3).reshape(B, H * W, C)
    o = ctx @ params["wo_t"] + params["bo"]
    mu = o.mean(-1, keepdims=True)
    var = ((o - mu) ** 2).mean(-1, keepdims=True)
    y = (o - mu) / jnp.sqrt(var + eps) * params["ln_g"] + params["ln_b"]
    y = y.reshape(B, H, W, C).transpose(0, 3, 1, 2)
    return (y + x) / rescale


if __name__ == "__main__":
    # Module config: channels=32, num_head_channels=16 -> num_heads=2,
    # num_groups=8, eps=1e-5, rescale_output_factor=2.0, dropout inactive.
    B, C, H, W = 2, 32, 8, 8
    num_groups, num_head_channels = 8, 16
    num_heads = C // num_head_channels
    eps, rescale = 1e-5, 2.0

    key = jax.random.PRNGKey(0)
    ks = jax.random.split(key, 16)
    params = {
        "wq_t": 0.1 * jax.random.normal(ks[0], (C, C), jnp.float32),
        "bq": 0.05 * jax.random.normal(ks[1], (C,), jnp.float32),
        "wk_t": 0.1 * jax.random.normal(ks[2], (C, C), jnp.float32),
        "bk": 0.05 * jax.random.normal(ks[3], (C,), jnp.float32),
        "wv_t": 0.1 * jax.random.normal(ks[4], (C, C), jnp.float32),
        "bv": 0.05 * jax.random.normal(ks[5], (C,), jnp.float32),
        "wo_t": 0.1 * jax.random.normal(ks[6], (C, C), jnp.float32),
        "bo": 0.05 * jax.random.normal(ks[7], (C,), jnp.float32),
        "gn_g": 1.0 + 0.1 * jax.random.normal(ks[8], (C,), jnp.float32),
        "gn_b": 0.1 * jax.random.normal(ks[9], (C,), jnp.float32),
        "ln_g": 1.0 + 0.1 * jax.random.normal(ks[10], (C,), jnp.float32),
        "ln_b": 0.1 * jax.random.normal(ks[11], (C,), jnp.float32),
    }
    x = jax.random.normal(ks[12], (B, C, H, W), jnp.float32)

    out = attention_block(x, params, num_groups=num_groups, num_heads=num_heads,
                          eps=eps, rescale=rescale)
    out = jax.block_until_ready(out)

    # Reference uses the same bf16-quantized weight matrices the kernel consumes
    # (round-tripped to f32), so the comparison isolates kernel numerics from the
    # deliberate bf16 weight storage; biases / norm params stay f32 in both.
    params_ref = dict(params)
    for name in ("wq_t", "wk_t", "wv_t", "wo_t"):
        params_ref[name] = params[name].astype(jnp.bfloat16).astype(jnp.float32)
    ref = reference(x, params_ref, num_groups=num_groups, num_heads=num_heads,
                    eps=eps, rescale=rescale)

    assert out.shape == x.shape and out.dtype == x.dtype
    # bf16 MXU operands with f32 accumulation; the LayerNorm amplifies small-|o|
    # rounding at this toy weight scale, hence the 3e-2 tolerance.
    max_err = jnp.max(jnp.abs(out - ref))
    assert jnp.allclose(out, ref, atol=3e-2, rtol=3e-2), f"max abs err {max_err}"
    print("KERNEL_OK")
</pallas_src>

<mosaic_0001>
module attributes {stable_mosaic.version = 11 : i64} {
  func.func @attention_block_kernel(%arg0: i32, %arg1: memref<1x64x32xf32, #tpu.memory_space<vmem>>, %arg2: memref<32x32xf32, #tpu.memory_space<vmem>>, %arg3: memref<32x96xbf16, #tpu.memory_space<vmem>>, %arg4: memref<1x96xf32, #tpu.memory_space<vmem>>, %arg5: memref<32x32xbf16, #tpu.memory_space<vmem>>, %arg6: memref<1x32xf32, #tpu.memory_space<vmem>>, %arg7: memref<1x32xf32, #tpu.memory_space<vmem>>, %arg8: memref<1x32xf32, #tpu.memory_space<vmem>>, %arg9: memref<1x32xf32, #tpu.memory_space<vmem>>, %arg10: memref<1x32xf32, #tpu.memory_space<vmem>>, %arg11: memref<1x64x32xf32, #tpu.memory_space<vmem>>) attributes {dimension_semantics = [#tpu.dimension_semantics<parallel>], iteration_bounds = array<i64: 2>, scalar_prefetch = 0 : i64, scratch_operands = 0 : i64, tpu.core_type = #tpu.core_type<tc>, window_params = [{transform_indices = @transform_0, window_bounds = array<i64: 1, 64, 32>}, {pipeline_mode = #tpu.pipeline_mode<synchronous>, transform_indices = @transform_1, window_bounds = array<i64: 32, 32>}, {pipeline_mode = #tpu.pipeline_mode<synchronous>, transform_indices = @transform_2, window_bounds = array<i64: 32, 96>}, {pipeline_mode = #tpu.pipeline_mode<synchronous>, transform_indices = @transform_3, window_bounds = array<i64: 1, 96>}, {pipeline_mode = #tpu.pipeline_mode<synchronous>, transform_indices = @transform_4, window_bounds = array<i64: 32, 32>}, {pipeline_mode = #tpu.pipeline_mode<synchronous>, transform_indices = @transform_5, window_bounds = array<i64: 1, 32>}, {pipeline_mode = #tpu.pipeline_mode<synchronous>, transform_indices = @transform_6, window_bounds = array<i64: 1, 32>}, {pipeline_mode = #tpu.pipeline_mode<synchronous>, transform_indices = @transform_7, window_bounds = array<i64: 1, 32>}, {pipeline_mode = #tpu.pipeline_mode<synchronous>, transform_indices = @transform_8, window_bounds = array<i64: 1, 32>}, {pipeline_mode = #tpu.pipeline_mode<synchronous>, transform_indices = @transform_9, window_bounds = array<i64: 1, 32>}, {transform_indices = @transform_10, window_bounds = array<i64: 1, 64, 32>}]} {
    %c0 = arith.constant 0 : index
    %c0_0 = arith.constant 0 : index
    %c0_1 = arith.constant 0 : index
    %0 = vector.load %arg1[%c0, %c0_0, %c0_1] : memref<1x64x32xf32, #tpu.memory_space<vmem>>, vector<1x64x32xf32>
    %c0_2 = arith.constant 0 : index
    %c0_3 = arith.constant 0 : index
    %1 = vector.load %arg2[%c0_2, %c0_3] : memref<32x32xf32, #tpu.memory_space<vmem>>, vector<32x32xf32>
    %cst = arith.constant dense<0.000000e+00> : vector<1x32xf32>
    %2 = vector.multi_reduction <add>, %0, %cst [1] : vector<1x64x32xf32> to vector<1x32xf32>
    %cst_4 = arith.constant dense<0.000000e+00> : vector<1x32xf32>
    %3 = tpu.matmul %2, %1, %cst_4 {dimension_numbers = #tpu.dot_dimension_numbers<[1], [0], [0], [1], [0, 0, 1, 1], [], []>} : vector<1x32xf32>, vector<32x32xf32>, vector<1x32xf32> -> vector<1x32xf32>
    %4 = vector.shape_cast %3 : vector<1x32xf32> to vector<1x1x32xf32>
    %5 = vector.broadcast %4 : vector<1x1x32xf32> to vector<1x64x32xf32>
    %6 = arith.subf %0, %5 : vector<1x64x32xf32>
    %7 = arith.mulf %6, %6 : vector<1x64x32xf32>
    %cst_5 = arith.constant dense<0.000000e+00> : vector<1x32xf32>
    %8 = vector.multi_reduction <add>, %7, %cst_5 [1] : vector<1x64x32xf32> to vector<1x32xf32>
    %cst_6 = arith.constant dense<0.000000e+00> : vector<1x32xf32>
    %9 = tpu.matmul %8, %1, %cst_6 {dimension_numbers = #tpu.dot_dimension_numbers<[1], [0], [0], [1], [0, 0, 1, 1], [], []>} : vector<1x32xf32>, vector<32x32xf32>, vector<1x32xf32> -> vector<1x32xf32>
    %cst_7 = arith.constant 9.99999974E-6 : f32
    %10 = vector.broadcast %cst_7 : f32 to vector<1x32xf32>
    %11 = arith.addf %9, %10 : vector<1x32xf32>
    %12 = math.rsqrt %11 : vector<1x32xf32>
    %13 = vector.shape_cast %12 : vector<1x32xf32> to vector<1x1x32xf32>
    %14 = vector.broadcast %13 : vector<1x1x32xf32> to vector<1x64x32xf32>
    %15 = arith.mulf %6, %14 : vector<1x64x32xf32>
    %c0_8 = arith.constant 0 : index
    %c0_9 = arith.constant 0 : index
    %16 = vector.load %arg7[%c0_8, %c0_9] : memref<1x32xf32, #tpu.memory_space<vmem>>, vector<1x32xf32>
    %17 = vector.shape_cast %16 : vector<1x32xf32> to vector<1x1x32xf32>
    %18 = vector.broadcast %17 : vector<1x1x32xf32> to vector<1x64x32xf32>
    %19 = arith.mulf %15, %18 : vector<1x64x32xf32>
    %c0_10 = arith.constant 0 : index
    %c0_11 = arith.constant 0 : index
    %20 = vector.load %arg8[%c0_10, %c0_11] : memref<1x32xf32, #tpu.memory_space<vmem>>, vector<1x32xf32>
    %21 = vector.shape_cast %20 : vector<1x32xf32> to vector<1x1x32xf32>
    %22 = vector.broadcast %21 : vector<1x1x32xf32> to vector<1x64x32xf32>
    %23 = arith.addf %19, %22 : vector<1x64x32xf32>
    %24 = vector.shape_cast %23 : vector<1x64x32xf32> to vector<64x32xf32>
    %25 = arith.truncf %24 : vector<64x32xf32> to vector<64x32xbf16>
    %c0_12 = arith.constant 0 : index
    %c0_13 = arith.constant 0 : index
    %26 = vector.load %arg3[%c0_12, %c0_13] : memref<32x96xbf16, #tpu.memory_space<vmem>>, vector<32x96xbf16>
    %cst_14 = arith.constant dense<0.000000e+00> : vector<64x96xf32>
    %27 = tpu.matmul %25, %26, %cst_14 {dimension_numbers = #tpu.dot_dimension_numbers<[1], [0], [0], [1], [0, 0, 1, 1], [], []>} : vector<64x32xbf16>, vector<32x96xbf16>, vector<64x96xf32> -> vector<64x96xf32>
    %c0_15 = arith.constant 0 : index
    %c0_16 = arith.constant 0 : index
    %28 = vector.load %arg4[%c0_15, %c0_16] : memref<1x96xf32, #tpu.memory_space<vmem>>, vector<1x96xf32>
    %29 = vector.broadcast %28 : vector<1x96xf32> to vector<64x96xf32>
    %30 = arith.addf %27, %29 : vector<64x96xf32>
    %31 = vector.shape_cast %30 : vector<64x96xf32> to vector<1x64x96xf32>
    %32 = arith.truncf %31 : vector<1x64x96xf32> to vector<1x64x96xbf16>
    %c0_17 = arith.constant 0 : index
    %c0_18 = arith.constant 0 : index
    %33 = vector.load %arg5[%c0_17, %c0_18] : memref<32x32xbf16, #tpu.memory_space<vmem>>, vector<32x32xbf16>
    %34 = vector.extract_strided_slice %33 {offsets = [0, 0], sizes = [16, 32], strides = [1, 1]} : vector<32x32xbf16> to vector<16x32xbf16>
    %35 = vector.extract_strided_slice %33 {offsets = [16, 0], sizes = [16, 32], strides = [1, 1]} : vector<32x32xbf16> to vector<16x32xbf16>
    %c0_19 = arith.constant 0 : index
    %c0_20 = arith.constant 0 : index
    %36 = vector.load %arg6[%c0_19, %c0_20] : memref<1x32xf32, #tpu.memory_space<vmem>>, vector<1x32xf32>
    %37 = vector.shape_cast %36 : vector<1x32xf32> to vector<1x32xf32>
    %38 = vector.broadcast %37 : vector<1x32xf32> to vector<64x32xf32>
    %c0_21 = arith.constant 0 : index
    %c0_22 = arith.constant 0 : index
    %39 = vector.load %arg9[%c0_21, %c0_22] : memref<1x32xf32, #tpu.memory_space<vmem>>, vector<1x32xf32>
    %40 = vector.shape_cast %39 : vector<1x32xf32> to vector<1x32xf32>
    %41 = vector.broadcast %40 : vector<1x32xf32> to vector<64x32xf32>
    %c0_23 = arith.constant 0 : index
    %c0_24 = arith.constant 0 : index
    %42 = vector.load %arg10[%c0_23, %c0_24] : memref<1x32xf32, #tpu.memory_space<vmem>>, vector<1x32xf32>
    %43 = vector.shape_cast %42 : vector<1x32xf32> to vector<1x32xf32>
    %44 = vector.broadcast %43 : vector<1x32xf32> to vector<64x32xf32>
    %cst_25 = arith.constant 0.000000e+00 : f32
    %45 = vector.broadcast %cst_25 : f32 to vector<64x32xf32>
    %46 = vector.extract_strided_slice %32 {offsets = [0, 0, 0], sizes = [1, 64, 16], strides = [1, 1, 1]} : vector<1x64x96xbf16> to vector<1x64x16xbf16>
    %47 = vector.shape_cast %46 : vector<1x64x16xbf16> to vector<64x16xbf16>
    %48 = vector.extract_strided_slice %32 {offsets = [0, 0, 32], sizes = [1, 64, 16], strides = [1, 1, 1]} : vector<1x64x96xbf16> to vector<1x64x16xbf16>
    %49 = vector.shape_cast %48 : vector<1x64x16xbf16> to vector<64x16xbf16>
    %50 = vector.extract_strided_slice %32 {offsets = [0, 0, 64], sizes = [1, 64, 16], strides = [1, 1, 1]} : vector<1x64x96xbf16> to vector<1x64x16xbf16>
    %51 = vector.shape_cast %50 : vector<1x64x16xbf16> to vector<64x16xbf16>
    %cst_26 = arith.constant dense<0.000000e+00> : vector<64x64xf32>
    %52 = tpu.matmul %47, %49, %cst_26 {dimension_numbers = #tpu.dot_dimension_numbers<[1], [1], [0], [0], [0, 0, 1, 0], [], []>} : vector<64x16xbf16>, vector<64x16xbf16>, vector<64x64xf32> -> vector<64x64xf32>
    %cst_27 = arith.constant dense<0xFF800000> : vector<64xf32>
    %53 = vector.multi_reduction <maximumf>, %52, %cst_27 [1] : vector<64x64xf32> to vector<64xf32>
    %54 = vector.shape_cast %53 : vector<64xf32> to vector<64x1xf32>
    %55 = vector.broadcast %54 : vector<64x1xf32> to vector<64x64xf32>
    %56 = arith.subf %52, %55 : vector<64x64xf32>
    %57 = math.exp %56 : vector<64x64xf32>
    %cst_28 = arith.constant dense<0.000000e+00> : vector<64xf32>
    %58 = vector.multi_reduction <add>, %57, %cst_28 [1] : vector<64x64xf32> to vector<64xf32>
    %59 = vector.shape_cast %58 : vector<64xf32> to vector<64x1xf32>
    %60 = tpu.reciprocal %59 {approx = true} : vector<64x1xf32> -> vector<64x1xf32>
    %61 = vector.broadcast %60 : vector<64x1xf32> to vector<64x64xf32>
    %62 = arith.mulf %57, %61 : vector<64x64xf32>
    %63 = arith.truncf %62 : vector<64x64xf32> to vector<64x64xbf16>
    %cst_29 = arith.constant dense<0.000000e+00> : vector<64x16xf32>
    %64 = tpu.matmul %63, %51, %cst_29 {dimension_numbers = #tpu.dot_dimension_numbers<[1], [0], [0], [1], [0, 0, 1, 1], [], []>} : vector<64x64xbf16>, vector<64x16xbf16>, vector<64x16xf32> -> vector<64x16xf32>
    %65 = arith.truncf %64 : vector<64x16xf32> to vector<64x16xbf16>
    %cst_30 = arith.constant dense<0.000000e+00> : vector<64x32xf32>
    %66 = tpu.matmul %65, %34, %cst_30 {dimension_numbers = #tpu.dot_dimension_numbers<[1], [0], [0], [1], [0, 0, 1, 1], [], []>} : vector<64x16xbf16>, vector<16x32xbf16>, vector<64x32xf32> -> vector<64x32xf32>
    %67 = arith.addf %45, %66 : vector<64x32xf32>
    %68 = vector.extract_strided_slice %32 {offsets = [0, 0, 16], sizes = [1, 64, 16], strides = [1, 1, 1]} : vector<1x64x96xbf16> to vector<1x64x16xbf16>
    %69 = vector.shape_cast %68 : vector<1x64x16xbf16> to vector<64x16xbf16>
    %70 = vector.extract_strided_slice %32 {offsets = [0, 0, 48], sizes = [1, 64, 16], strides = [1, 1, 1]} : vector<1x64x96xbf16> to vector<1x64x16xbf16>
    %71 = vector.shape_cast %70 : vector<1x64x16xbf16> to vector<64x16xbf16>
    %72 = vector.extract_strided_slice %32 {offsets = [0, 0, 80], sizes = [1, 64, 16], strides = [1, 1, 1]} : vector<1x64x96xbf16> to vector<1x64x16xbf16>
    %73 = vector.shape_cast %72 : vector<1x64x16xbf16> to vector<64x16xbf16>
    %cst_31 = arith.constant dense<0.000000e+00> : vector<64x64xf32>
    %74 = tpu.matmul %69, %71, %cst_31 {dimension_numbers = #tpu.dot_dimension_numbers<[1], [1], [0], [0], [0, 0, 1, 0], [], []>} : vector<64x16xbf16>, vector<64x16xbf16>, vector<64x64xf32> -> vector<64x64xf32>
    %cst_32 = arith.constant dense<0xFF800000> : vector<64xf32>
    %75 = vector.multi_reduction <maximumf>, %74, %cst_32 [1] : vector<64x64xf32> to vector<64xf32>
    %76 = vector.shape_cast %75 : vector<64xf32> to vector<64x1xf32>
    %77 = vector.broadcast %76 : vector<64x1xf32> to vector<64x64xf32>
    %78 = arith.subf %74, %77 : vector<64x64xf32>
    %79 = math.exp %78 : vector<64x64xf32>
    %cst_33 = arith.constant dense<0.000000e+00> : vector<64xf32>
    %80 = vector.multi_reduction <add>, %79, %cst_33 [1] : vector<64x64xf32> to vector<64xf32>
    %81 = vector.shape_cast %80 : vector<64xf32> to vector<64x1xf32>
    %82 = tpu.reciprocal %81 {approx = true} : vector<64x1xf32> -> vector<64x1xf32>
    %83 = vector.broadcast %82 : vector<64x1xf32> to vector<64x64xf32>
    %84 = arith.mulf %79, %83 : vector<64x64xf32>
    %85 = arith.truncf %84 : vector<64x64xf32> to vector<64x64xbf16>
    %cst_34 = arith.constant dense<0.000000e+00> : vector<64x16xf32>
    %86 = tpu.matmul %85, %73, %cst_34 {dimension_numbers = #tpu.dot_dimension_numbers<[1], [0], [0], [1], [0, 0, 1, 1], [], []>} : vector<64x64xbf16>, vector<64x16xbf16>, vector<64x16xf32> -> vector<64x16xf32>
    %87 = arith.truncf %86 : vector<64x16xf32> to vector<64x16xbf16>
    %cst_35 = arith.constant dense<0.000000e+00> : vector<64x32xf32>
    %88 = tpu.matmul %87, %35, %cst_35 {dimension_numbers = #tpu.dot_dimension_numbers<[1], [0], [0], [1], [0, 0, 1, 1], [], []>} : vector<64x16xbf16>, vector<16x32xbf16>, vector<64x32xf32> -> vector<64x32xf32>
    %89 = arith.addf %67, %88 : vector<64x32xf32>
    %90 = arith.addf %89, %38 : vector<64x32xf32>
    %cst_36 = arith.constant dense<0.000000e+00> : vector<64xf32>
    %91 = vector.multi_reduction <add>, %90, %cst_36 [1] : vector<64x32xf32> to vector<64xf32>
    %92 = vector.shape_cast %91 : vector<64xf32> to vector<64x1xf32>
    %cst_37 = arith.constant 3.200000e+01 : f32
    %93 = vector.broadcast %cst_37 : f32 to vector<64x1xf32>
    %94 = arith.divf %92, %93 : vector<64x1xf32>
    %95 = vector.broadcast %94 : vector<64x1xf32> to vector<64x32xf32>
    %96 = arith.subf %90, %95 : vector<64x32xf32>
    %97 = arith.mulf %96, %96 : vector<64x32xf32>
    %cst_38 = arith.constant dense<0.000000e+00> : vector<64xf32>
    %98 = vector.multi_reduction <add>, %97, %cst_38 [1] : vector<64x32xf32> to vector<64xf32>
    %99 = vector.shape_cast %98 : vector<64xf32> to vector<64x1xf32>
    %cst_39 = arith.constant 3.200000e+01 : f32
    %100 = vector.broadcast %cst_39 : f32 to vector<64x1xf32>
    %101 = arith.divf %99, %100 : vector<64x1xf32>
    %102 = vector.broadcast %94 : vector<64x1xf32> to vector<64x32xf32>
    %103 = arith.subf %90, %102 : vector<64x32xf32>
    %cst_40 = arith.constant 9.99999974E-6 : f32
    %104 = vector.broadcast %cst_40 : f32 to vector<64x1xf32>
    %105 = arith.addf %101, %104 : vector<64x1xf32>
    %106 = math.rsqrt %105 : vector<64x1xf32>
    %107 = vector.broadcast %106 : vector<64x1xf32> to vector<64x32xf32>
    %108 = arith.mulf %103, %107 : vector<64x32xf32>
    %109 = arith.mulf %108, %41 : vector<64x32xf32>
    %110 = arith.addf %109, %44 : vector<64x32xf32>
    %111 = vector.shape_cast %0 : vector<1x64x32xf32> to vector<64x32xf32>
    %112 = arith.addf %110, %111 : vector<64x32xf32>
    %cst_41 = arith.constant 5.000000e-01 : f32
    %113 = vector.broadcast %cst_41 : f32 to vector<64x32xf32>
    %114 = arith.mulf %112, %113 : vector<64x32xf32>
    %c0_42 = arith.constant 0 : index
    %c0_43 = arith.constant 0 : index
    %c0_44 = arith.constant 0 : index
    %115 = vector.load %arg11[%c0_42, %c0_43, %c0_44] : memref<1x64x32xf32, #tpu.memory_space<vmem>>, vector<1x64x32xf32>
    %116 = vector.shape_cast %115 : vector<1x64x32xf32> to vector<64x32xf32>
    %117 = vector.shape_cast %114 : vector<64x32xf32> to vector<1x64x32xf32>
    tpu.vector_store %arg11[%c0_42, %c0_43, %c0_44], %117 {strides = array<i32>} : memref<1x64x32xf32, #tpu.memory_space<vmem>>, vector<1x64x32xf32>,
    return
  }
  func.func @transform_0(%arg0: i32) -> (i32, i32, i32) {
    %c0_i32 = arith.constant 0 : i32
    %c0_i32_0 = arith.constant 0 : i32
    %c0_i32_1 = arith.constant 0 : i32
    return %arg0, %c0_i32, %c0_i32_0 : i32, i32, i32
  }
  func.func @transform_1(%arg0: i32) -> (i32, i32) {
    %c0_i32 = arith.constant 0 : i32
    %c0_i32_0 = arith.constant 0 : i32
    %c0_i32_1 = arith.constant 0 : i32
    return %c0_i32, %c0_i32_0 : i32, i32
  }
  func.func @transform_2(%arg0: i32) -> (i32, i32) {
    %c0_i32 = arith.constant 0 : i32
    %c0_i32_0 = arith.constant 0 : i32
    %c0_i32_1 = arith.constant 0 : i32
    return %c0_i32, %c0_i32_0 : i32, i32
  }
  func.func @transform_3(%arg0: i32) -> (i32, i32) {
    %c0_i32 = arith.constant 0 : i32
    %c0_i32_0 = arith.constant 0 : i32
    %c0_i32_1 = arith.constant 0 : i32
    return %c0_i32, %c0_i32_0 : i32, i32
  }
  func.func @transform_4(%arg0: i32) -> (i32, i32) {
    %c0_i32 = arith.constant 0 : i32
    %c0_i32_0 = arith.constant 0 : i32
    %c0_i32_1 = arith.constant 0 : i32
    return %c0_i32, %c0_i32_0 : i32, i32
  }
  func.func @transform_5(%arg0: i32) -> (i32, i32) {
    %c0_i32 = arith.constant 0 : i32
    %c0_i32_0 = arith.constant 0 : i32
    %c0_i32_1 = arith.constant 0 : i32
    return %c0_i32, %c0_i32_0 : i32, i32
  }
  func.func @transform_6(%arg0: i32) -> (i32, i32) {
    %c0_i32 = arith.constant 0 : i32
    %c0_i32_0 = arith.constant 0 : i32
    %c0_i32_1 = arith.constant 0 : i32
    return %c0_i32, %c0_i32_0 : i32, i32
  }
  func.func @transform_7(%arg0: i32) -> (i32, i32) {
    %c0_i32 = arith.constant 0 : i32
    %c0_i32_0 = arith.constant 0 : i32
    %c0_i32_1 = arith.constant 0 : i32
    return %c0_i32, %c0_i32_0 : i32, i32
  }
  func.func @transform_8(%arg0: i32) -> (i32, i32) {
    %c0_i32 = arith.constant 0 : i32
    %c0_i32_0 = arith.constant 0 : i32
    %c0_i32_1 = arith.constant 0 : i32
    return %c0_i32, %c0_i32_0 : i32, i32
  }
  func.func @transform_9(%arg0: i32) -> (i32, i32) {
    %c0_i32 = arith.constant 0 : i32
    %c0_i32_0 = arith.constant 0 : i32
    %c0_i32_1 = arith.constant 0 : i32
    return %c0_i32, %c0_i32_0 : i32, i32
  }
  func.func @transform_10(%arg0: i32) -> (i32, i32, i32) {
    %c0_i32 = arith.constant 0 : i32
    %c0_i32_0 = arith.constant 0 : i32
    %c0_i32_1 = arith.constant 0 : i32
    return %arg0, %c0_i32, %c0_i32_0 : i32, i32, i32
  }
}

</mosaic_0001>

<bundles_post_ra>
// kernel: tpu_custom_call.1
= control target key start
LH: loop header
LB: loop body
LE: loop exit
PB: predicated region body
PF: predicated region fallthrough
CT: control target
= control target key end

     0   :  { %s1686_s13 = smov 0   ;;  %s2172_s0 = inlined_call_operand.vmem [shape: f32[2,64,32], index: 0, kind: input, shape index: {}]   ;;  %s2173_s1 = inlined_call_operand.vmem [shape: f32[32,32], index: 1, kind: input, shape index: {}]   ;;  %s2174_s2 = inlined_call_operand.vmem [shape: bf16[32,96], index: 2, kind: input, shape index: {}]   ;;  %s2175_s3 = inlined_call_operand.vmem [shape: f32[1,96], index: 3, kind: input, shape index: {}]   ;;  %s2176_s4 = inlined_call_operand.vmem [shape: bf16[32,32], index: 4, kind: input, shape index: {}]   ;;  %s2177_s5 = inlined_call_operand.vmem [shape: f32[1,32], index: 5, kind: input, shape index: {}]   ;;  %s2178_s6 = inlined_call_operand.vmem [shape: f32[1,32], index: 6, kind: input, shape index: {}]   ;;  %s2179_s7 = inlined_call_operand.vmem [shape: f32[1,32], index: 7, kind: input, shape index: {}]   ;;  %s2180_s8 = inlined_call_operand.vmem [shape: f32[1,32], index: 8, kind: input, shape index: {}]   ;;  %s2181_s9 = inlined_call_operand.vmem [shape: f32[1,32], index: 9, kind: input, shape index: {}]   ;;  %s2182_s10 = inlined_call_operand.vmem [shape: f32[2,64,32], index: 10, kind: output, shape index: {}]  }
   0x1 LB: > { %s1441_s14 = sadd.s32 4294967295, %s1623_s13   ;;  %p1445_p0 = scmp.ge.s32.totalorder %s1623_s13, 1  ;;  %s1623_s13 = sphi %s1686_s13, %s20_s13  }
   0x2   : > { %p312_p1 = scmp.lt.s32.totalorder %s1623_s13, 3 }
   0x4   : > { %p313_p2 = pnand %p1445_p0, %p312_p1 }
   0x5   : > { %p350_p3 = scmp.lt.s32.totalorder (!%p313_p2), %s1441_s14, 1  ;;  %s1625_s19 = smov (!%p313_p2), 96  }
   0x6   : > { %316 = sbr.rel (%p313_p2) target bundleno = 1781 (0x6f5), region = 60  ;;  %s1626_s20 = smov (!%p313_p2), 80  }
   0x7   : > { %s1627_s21 = smov (!%p313_p2), 112   ;;  %s1628_s22 = smov (!%p313_p2), 48  }
   0x8   : > { %s1629_s24 = smov (!%p313_p2), 64  }
   0xb   : > { %v372_v0 = vld [vmem:[%s2173_s1 + $0x18] sm:$0xff]  ;;  %v371_v1 = vld [vmem:[%s2173_s1 + $0x10] sm:$0xff]  ;;  %v370_v2 = vld [vmem:[%s2173_s1 + $0x8] sm:$0xff]  ;;  %s2184_s14 = smov (!%p350_p3, %s1441_s14), 1  ;;  %vm373_vm0 = vcmask 261120   ;;  %vm639_vm4 = vcmask 130048  }
   0xc   : > { %410 = vmatpush.msra.mxu1 %v372_v0  ;;  %v369_v3 = vld [vmem:[%s2173_s1] sm:$0xff]  ;;  %s1498_s23 = sshll.u32 %s2184_s14, 6  ;;  %vm693_vm5 = vcmask 523264  }
   0xd   : > { %s1714_s26 = scalar_lea.vmem %s2172_s0, %s1498_s23 }
   0xe   : > { %411 = vmatpush.msra.mxu1 %v371_v1  ;;  %v361_v4 = vld [vmem:[%s1714_s26] sm:$0xff]  ;;  %v362_v5 = vld [vmem:[%s1714_s26 + $0x8] sm:$0xff]  ;;  %v363_v6 = vld [vmem:[%s1714_s26 + $0x10] sm:$0xff] }
   0xf   : > { %v364_v7 = vld [vmem:[%s1714_s26 + $0x18] sm:$0xff]  ;;  %v374_v8 = vsel %vm373_vm0, %v361_v4, 0.0  ;;  %v375_v9 = vsel %vm373_vm0, %v362_v5, 0.0  ;;  %v377_v10 = vsel %vm373_vm0, %v363_v6, 0.0  ;;  %v365_v11 = vld [vmem:[%s1714_s26 + $0x20] sm:$0xff]  ;;  %v366_v14 = vld [vmem:[%s1714_s26 + $0x28] sm:$0xff] }
  0x10   : > { %412 = vmatpush.msra.mxu1 %v370_v2  ;;  %v376_v12 = vadd.f32 %v375_v9, %v374_v8  ;;  %v379_v13 = vsel %vm373_vm0, %v364_v7, 0.0  ;;  %v381_v16 = vsel %vm373_vm0, %v365_v11, 0.0  ;;  %v367_v17 = vld [vmem:[%s1714_s26 + $0x30] sm:$0xff]  ;;  %v383_v19 = vsel %vm373_vm0, %v366_v14, 0.0  ;;  %v368_v20 = vld [vmem:[%s1714_s26 + $0x38] sm:$0xff]  ;;  %v1501_v8 = vld [vmem:[%s2174_s2 + $0x8] sm:$0xff] }
  0x11   : > { %v385_v22 = vsel %vm373_vm0, %v367_v17, 0.0  ;;  %v387_v24 = vsel %vm373_vm0, %v368_v20, 0.0  ;;  %564 = vmatpush.bf16.msra.mxu2 %v1501_v8  ;;  %v1500_v9 = vld [vmem:[%s2174_s2] sm:$0xff] }
  0x12   : > { %413 = vmatpush.msra.mxu1 %v369_v3  ;;  %v378_v15 = vadd.f32 %v377_v10, %v376_v12 }
  0x14   : > { %471 = vmatpush.msrb.mxu1 %v372_v0  ;;  %v380_v18 = vadd.f32 %v379_v13, %v378_v15 }
  0x15   : > { %565 = vmatpush.bf16.msra.mxu2 %v1500_v9 }
  0x16   : > { %472 = vmatpush.msrb.mxu1 %v371_v1  ;;  %v382_v21 = vadd.f32 %v381_v16, %v380_v18 }
  0x18   : > { %473 = vmatpush.msrb.mxu1 %v370_v2  ;;  %v384_v23 = vadd.f32 %v383_v19, %v382_v21 }
  0x1a   : > { %474 = vmatpush.msrb.mxu1 %v369_v3  ;;  %v386_v25 = vadd.f32 %v385_v22, %v384_v23  ;;  %v1520_v23 = vld [vmem:[%s2179_s7] ss:$0 sm:$0xff] }
  0x1c   : > { %v388_v26 = vadd.f32 %v387_v24, %v386_v25 }
  0x1e   : > { %v389_v27 = vrot.slane %v388_v26, 4 }
  0x20   : > { %v390_v28 = vadd.f32 %v389_v27, %v388_v26 }
  0x22   : > { %v391_v29 = vrot.slane %v390_v28, 2 }
  0x24   : > { %v392_v30 = vadd.f32 %v391_v29, %v390_v28 }
  0x26   : > { %v393_v31 = vrot.slane %v392_v30, 1 }
  0x28   : > { %v394_v32 = vadd.f32 %v393_v31, %v392_v30 }
  0x2a   : > { %1450 = vmatmul.msk.f32.vlgmr.msra.gmra.mxu1 %vm373_vm0, %v394_v32 }
  0xa7   : > { %v415_v33 = vpop.f32.mrf.mxu1 }
  0xa8   : > { %v418_v34 = vperm.slane %v415_v33, 0 }
  0xaa   : > { %v419_v35 = vsub.f32 %v361_v4, %v418_v34  ;;  %v420_v36 = vsub.f32 %v362_v5, %v418_v34  ;;  %v1733_v37 = vsub.f32 %v363_v6, %v418_v34  ;;  %v1735_v38 = vsub.f32 %v364_v7, %v418_v34 }
  0xab   : > { %v1737_v39 = vsub.f32 %v365_v11, %v418_v34  ;;  %v1741_v43 = vsub.f32 %v366_v14, %v418_v34  ;;  %v1747_v48 = vsub.f32 %v367_v17, %v418_v34  ;;  %v1752_v52 = vsub.f32 %v368_v20, %v418_v34  ;;  %v1519_v20 = vld [vmem:[%s2178_s6] ss:$0 sm:$0xff] }
  0xac   : > { %v427_v40 = vmul.f32 %v419_v35, %v419_v35  ;;  %v428_v41 = vmul.f32 %v420_v36, %v420_v36  ;;  %v429_v42 = vmul.f32 %v1733_v37, %v1733_v37  ;;  %v430_v44 = vmul.f32 %v1735_v38, %v1735_v38 }
  0xad   : > { %v431_v49 = vmul.f32 %v1737_v39, %v1737_v39  ;;  %v432_v53 = vmul.f32 %v1741_v43, %v1741_v43  ;;  %v433_v56 = vmul.f32 %v1747_v48, %v1747_v48  ;;  %v434_v59 = vmul.f32 %v1752_v52, %v1752_v52 }
  0xae   : > { %v435_v45 = vsel %vm373_vm0, %v427_v40, 0.0  ;;  %v436_v46 = vsel %vm373_vm0, %v428_v41, 0.0  ;;  %v438_v50 = vsel %vm373_vm0, %v429_v42, 0.0  ;;  %v440_v54 = vsel %vm373_vm0, %v430_v44, 0.0 }
  0xaf   : > { %v437_v47 = vadd.f32 %v436_v46, %v435_v45  ;;  %v442_v57 = vsel %vm373_vm0, %v431_v49, 0.0  ;;  %v444_v60 = vsel %vm373_vm0, %v432_v53, 0.0  ;;  %v446_v62 = vsel %vm373_vm0, %v433_v56, 0.0 }
  0xb0   : > { %v448_v0 = vsel %vm373_vm0, %v434_v59, 0.0 }
  0xb1   : > { %v439_v51 = vadd.f32 %v438_v50, %v437_v47 }
  0xb3   : > { %v441_v55 = vadd.f32 %v440_v54, %v439_v51 }
  0xb5   : > { %v443_v58 = vadd.f32 %v442_v57, %v441_v55  ;;  %v1521_v55 = vld [vmem:[%s2175_s3] ss:$0 sm:$0xff] }
  0xb7   : > { %v445_v61 = vadd.f32 %v444_v60, %v443_v58 }
  0xb9   : > { %v447_v63 = vadd.f32 %v446_v62, %v445_v61 }
  0xbb   : > { %v449_v1 = vadd.f32 %v448_v0, %v447_v63 }
  0xbd   : > { %v450_v2 = vrot.slane %v449_v1, 4 }
  0xbf   : > { %v451_v3 = vadd.f32 %v450_v2, %v449_v1 }
  0xc1   : > { %v452_v4 = vrot.slane %v451_v3, 2 }
  0xc3   : > { %v453_v5 = vadd.f32 %v452_v4, %v451_v3 }
  0xc5   : > { %v454_v6 = vrot.slane %v453_v5, 1 }
  0xc7   : > { %v455_v7 = vadd.f32 %v454_v6, %v453_v5 }
  0xc9   : > { %1451 = vmatmul.msk.f32.vlgmr.msrb.gmra.mxu1 %vm373_vm0, %v455_v7 }
 0x146   : > { %v476_v10 = vpop.f32.mrf.mxu1 }
 0x147   : > { %v477_v11 = vadd.f32 1e-05, %v476_v10 }
 0x149   : > { %1525 = vrsqrt.f32 %v477_v11  ;;  %vm485_vm2 = vweird.f32 %v477_v11 }
 0x14f   : > { %v1526_v12 = vpop.eup %1525 }
 0x150   : > { %v480_v13 = vmul.f32 %v1526_v12, %v477_v11  ;;  %vm486_vm1 = vweird.f32 %v1526_v12 }
 0x151   : > { %vm487_vm3 = vmor %vm485_vm2, %vm486_vm1 }
 0x152   : > { %v481_v14 = vmul.f32 %v1526_v12, %v480_v13 }
 0x154   : > { %v482_v15 = vmul.f32 0.5, %v481_v14 }
 0x156   : > { %v483_v16 = vsub.f32 1.5, %v482_v15 }
 0x158   : > { %v484_v17 = vmul.f32 %v1526_v12, %v483_v16 }
 0x15a   : > { %v488_v18 = vsel %vm487_vm3, %v1526_v12, %v484_v17 }
 0x15b   : > { %v489_v19 = vperm.slane %v488_v18, 0 }
 0x15d   : > { %v490_v21 = vmul.f32 %v489_v19, %v419_v35  ;;  %v491_v22 = vmul.f32 %v489_v19, %v420_v36  ;;  %v492_v29 = vmul.f32 %v489_v19, %v1733_v37  ;;  %v493_v30 = vmul.f32 %v489_v19, %v1735_v38 }
 0x15e   : > { %v494_v36 = vmul.f32 %v489_v19, %v1737_v39  ;;  %v495_v40 = vmul.f32 %v489_v19, %v1741_v43  ;;  %v496_v37 = vmul.f32 %v489_v19, %v1747_v48  ;;  %v497_v38 = vmul.f32 %v489_v19, %v1752_v52 }
 0x15f   : > { %v502_v24 = vmul.f32 %v1519_v20, %v490_v21  ;;  %v503_v25 = vmul.f32 %v1519_v20, %v491_v22  ;;  %v504_v31 = vmul.f32 %v1519_v20, %v492_v29  ;;  %v505_v32 = vmul.f32 %v1519_v20, %v493_v30 }
 0x160   : > { %v506_v41 = vmul.f32 %v1519_v20, %v494_v36  ;;  %v507_v42 = vmul.f32 %v1519_v20, %v495_v40  ;;  %v508_v47 = vmul.f32 %v1519_v20, %v496_v37  ;;  %v509_v49 = vmul.f32 %v1519_v20, %v497_v38 }
 0x161   : > { %v514_v26 = vadd.f32 %v1520_v23, %v502_v24  ;;  %v515_v27 = vadd.f32 %v1520_v23, %v503_v25  ;;  %v516_v33 = vadd.f32 %v1520_v23, %v504_v31  ;;  %v517_v34 = vadd.f32 %v1520_v23, %v505_v32 }
 0x162   : > { %v518_v44 = vadd.f32 %v1520_v23, %v506_v41  ;;  %v519_v45 = vadd.f32 %v1520_v23, %v507_v42  ;;  %v520_v50 = vadd.f32 %v1520_v23, %v508_v47  ;;  %v521_v51 = vadd.f32 %v1520_v23, %v509_v49 }
 0x163   : > { %v522_v28 = vpack.c.bf16 %v515_v27, %v514_v26  ;;  %v523_v35 = vpack.c.bf16 %v517_v34, %v516_v33 }
 0x164   : > { %v524_v46 = vpack.c.bf16 %v519_v45, %v518_v44  ;;  %v525_v53 = vpack.c.bf16 %v521_v51, %v520_v50 }
 0x165   : > { %1460 = vmatmul.msk.bf16.vlgmr.msra.gmra.mxu2 %vm373_vm0, %v522_v28 }
 0x175   : > { %1461 = vmatmul.msk.bf16.gmra.mxu2 %vm373_vm0, %v523_v35 }
 0x185   : > { %1462 = vmatmul.msk.bf16.gmra.mxu2 %vm373_vm0, %v524_v46 }
 0x195   : > { %1463 = vmatmul.msk.bf16.gmra.mxu2 %vm373_vm0, %v525_v53 }
 0x1e8   : > { %v567_v39 = vpop.f32.mrf.mxu2 }
 0x1e9   : > { %v568_v0 = vadd.f32 %v1521_v55, %v567_v39 }
 0x1eb   : > { %v587_v4 = vpack.c.bf16 %v568_v0, %v568_v0 }
 0x1ed   : > { %v619_v9 = vunpack.c.l.b16 %v587_v4 }
 0x1f0   : > { %v569_v43 = vpop.f32.mrf.mxu2 }
 0x1f1   : > { %v570_v63 = vadd.f32 %v1521_v55, %v569_v43 }
 0x1f3   : > { %v588_v2 = vpack.c.bf16 %v570_v63, %v570_v63 }
 0x1f5   : > { %v620_v7 = vunpack.c.l.b16 %v588_v2 }
 0x1f7   : > { %v1796_v12 = vpack.c.b16 %v620_v7, %v619_v9 }
 0x1f8   : > { %v572_v54 = vpop.f32.mrf.mxu2 }
 0x1f9   : > { %v573_v56 = vadd.f32 %v1521_v55, %v572_v54 }
 0x1fb   : > { %v589_v58 = vpack.c.bf16 %v573_v56, %v573_v56 }
 0x1fd   : > { %v621_v52 = vunpack.c.l.b16 %v589_v58 }
 0x200   : > { %v574_v57 = vpop.f32.mrf.mxu2 }
 0x201   : > { %v575_v48 = vadd.f32 %v1521_v55, %v574_v57 }
 0x203   : > { %v590_v59 = vpack.c.bf16 %v575_v48, %v575_v48 }
 0x205   : > { %v622_v60 = vunpack.c.l.b16 %v590_v59 }
 0x207   : > { %v1791_v61 = vpack.c.b16 %v622_v60, %v621_v52 }
 0x208   : > { %v577_v62 = vpop.f32.mrf.mxu2 }
 0x209   : > { %633 = vrot.lane.b32.xlu2 %v1791_v61, %s1625_s19  ;;  %v578_v1 = vadd.f32 %v1521_v55, %v577_v62 }
 0x20b   : > { %v591_v5 = vpack.c.bf16 %v578_v1, %v578_v1 }
 0x20d   : > { %v623_v10 = vunpack.c.l.b16 %v591_v5 }
 0x210   : > { %v579_v3 = vpop.f32.mrf.mxu2 }
 0x211   : > { %v580_v6 = vadd.f32 %v1521_v55, %v579_v3  ;;  %853 = vrot.lane.b32.xlu2 %v1791_v61, %s1626_s20 }
 0x213   : > { %v592_v8 = vpack.c.bf16 %v580_v6, %v580_v6 }
 0x215   : > { %v624_v11 = vunpack.c.l.b16 %v592_v8 }
 0x217   : > { %v1798_v13 = vpack.c.b16 %v624_v11, %v623_v10 }
 0x218   : > { %v582_v14 = vpop.f32.mrf.mxu2 }
 0x219   : > { %635 = vrot.lane.b32.xlu1 %v1798_v13, %s1625_s19  ;;  %843 = vrot.lane.b32.xlu2 %v1796_v12, %s1627_s21  ;;  %v583_v15 = vadd.f32 %v1521_v55, %v582_v14 }
 0x21b   : > { %v593_v17 = vpack.c.bf16 %v583_v15, %v583_v15 }
 0x21d   : > { %v625_v20 = vunpack.c.l.b16 %v593_v17 }
 0x220   : > { %v584_v16 = vpop.f32.mrf.mxu2 }
 0x221   : > { %v585_v18 = vadd.f32 %v1521_v55, %v584_v16  ;;  %855 = vrot.lane.b32.xlu1 %v1798_v13, %s1626_s20 }
 0x223   : > { %v594_v19 = vpack.c.bf16 %v585_v18, %v585_v18 }
 0x225   : > { %v626_v21 = vunpack.c.l.b16 %v594_v19 }
 0x227   : > { %v1804_v22 = vpack.c.b16 %v626_v21, %v625_v20 }
 0x229   : > { %637 = vrot.lane.b32.xlu0 %v1804_v22, %s1625_s19  ;;  %849 = vrot.lane.b32.xlu2 %v1804_v22, %s1627_s21 }
 0x22a   : > { %851 = vrot.lane.b32.xlu1 %v1796_v12, %s1626_s20 }
 0x231   : > { %857 = vrot.lane.b32.xlu0 %v1804_v22, %s1626_s20  ;;  %s2117_s20 = scalar_lea.vmem %s2182_s10, %s1498_s23 }
 0x232   : > { %847 = vrot.lane.b32.xlu1 %v1798_v13, %s1627_s21 }
 0x239   : > { %631 = vrot.lane.b32.xlu0 %v1796_v12, %s1625_s19 }
 0x241   : > { %845 = vrot.lane.b32.xlu0 %v1791_v61, %s1627_s21 }
 0x263   : > { %v634_v29 = vpop.permute.xlu2 %633 }
 0x264   : > { %v656_v32 = vsel %vm639_vm4, %v634_v29, 0 }
 0x26b   : > { %v854_v33 = vpop.permute.xlu2 %853 }
 0x26c   : > { %v875_v35 = vsel %vm639_vm4, %v854_v33, 0 }
 0x273   : > { %v844_v42 = vpop.permute.xlu2 %843 }
 0x283   : > { %v850_v46 = vpop.permute.xlu2 %849 }
 0x28b   : > { %v636_v25 = vpop.permute.xlu1 %635 }
 0x28c   : > { %v659_v28 = vsel %vm639_vm4, %v636_v25, 0 }
 0x293   : > { %v856_v30 = vpop.permute.xlu1 %855 }
 0x294   : > { %v878_v31 = vsel %vm639_vm4, %v856_v30, 0 }
 0x29b   : > { %v638_v23 = vpop.permute.xlu0 %637 }
 0x29c   : > { %v662_v24 = vsel %vm639_vm4, %v638_v23, 0  ;;  %v852_v40 = vpop.permute.xlu1 %851 }
 0x29d   : > { %668 = vmatpush.bf16.xpose.msra.mxu3 %v662_v24  ;;  %v872_v41 = vsel %vm639_vm4, %v852_v40, 0 }
 0x2a3   : > { %v858_v26 = vpop.permute.xlu0 %857 }
 0x2a4   : > { %v881_v27 = vsel %vm639_vm4, %v858_v26, 0  ;;  %v848_v45 = vpop.permute.xlu1 %847 }
 0x2a5   : > { %669 = vmatpush.bf16.xpose.msra.mxu3 %v659_v28  ;;  %887 = vmatpush.bf16.xpose.msra.mxu1 %v881_v27 }
 0x2ab   : > { %v632_v34 = vpop.permute.xlu0 %631 }
 0x2ac   : > { %v653_v36 = vsel %vm639_vm4, %v632_v34, 0 }
 0x2ad   : > { %670 = vmatpush.bf16.xpose.msra.mxu3 %v656_v32  ;;  %888 = vmatpush.bf16.xpose.msra.mxu1 %v878_v31 }
 0x2b3   : > { %v846_v44 = vpop.permute.xlu0 %845 }
 0x2b5   : > { %671 = vmatpush.bf16.xpose.msra.mxu3 %v653_v36  ;;  %889 = vmatpush.bf16.xpose.msra.mxu1 %v875_v35 }
 0x2bc   : > { %1464 = vmatmul.msk.bf16.vlgmr.msra.gmra.mxu3 %vm639_vm4, %v1796_v12 }
 0x2bd   : > { %890 = vmatpush.bf16.xpose.msra.mxu1 %v872_v41 }
 0x2c4   : > { %1472 = vmatmul.msk.bf16.vlgmr.msra.gmra.mxu1 %vm639_vm4, %v844_v42 }
 0x2cc   : > { %1465 = vmatmul.msk.bf16.gmra.mxu3 %vm639_vm4, %v1791_v61 }
 0x2d4   : > { %1473 = vmatmul.msk.bf16.gmra.mxu1 %vm639_vm4, %v846_v44 }
 0x2dc   : > { %1466 = vmatmul.msk.bf16.gmra.mxu3 %vm639_vm4, %v1798_v13 }
 0x2e4   : > { %1474 = vmatmul.msk.bf16.gmra.mxu1 %vm639_vm4, %v848_v45 }
 0x2ec   : > { %1467 = vmatmul.msk.bf16.gmra.mxu3 %vm639_vm4, %v1804_v22 }
 0x2f4   : > { %1475 = vmatmul.msk.bf16.gmra.mxu1 %vm639_vm4, %v850_v46 }
 0x33f   : > { %v673_v37 = vpop.f32.mrf.mxu3 }
 0x340   : > { %v694_v38 = vsel %vm693_vm5, %v673_v37, -inf }
 0x341   : > { %v892_v47 = vpop.f32.mrf.mxu1  ;;  %695 = vmax.xlane.f32.xlu0 %v694_v38 }
 0x342   : > { %v912_v49 = vsel %vm693_vm5, %v892_v47, -inf }
 0x343   : > { %913 = vmax.xlane.f32.xlu2 %v912_v49 }
 0x347   : > { %v1837_v50 = vpop.f32.mrf.mxu3 }
 0x348   : > { %v697_v51 = vsel %vm693_vm5, %v1837_v50, -inf }
 0x349   : > { %v1841_v53 = vpop.f32.mrf.mxu1  ;;  %698 = vmax.xlane.f32.xlu1 %v697_v51 }
 0x34a   : > { %v915_v39 = vsel %vm693_vm5, %v1841_v53, -inf }
 0x34b   : > { %916 = vmax.xlane.f32.xlu2 %v915_v39 }
 0x34f   : > { %v1845_v43 = vpop.f32.mrf.mxu3 }
 0x350   : > { %v700_v54 = vsel %vm693_vm5, %v1845_v43, -inf }
 0x351   : > { %701 = vmax.xlane.f32.xlu0 %v700_v54  ;;  %v1849_v55 = vpop.f32.mrf.mxu1 }
 0x352   : > { %v918_v56 = vsel %vm693_vm5, %v1849_v55, -inf }
 0x353   : > { %919 = vmax.xlane.f32.xlu2 %v918_v56 }
 0x357   : > { %v1867_v48 = vpop.f32.mrf.mxu3 }
 0x358   : > { %v703_v6 = vsel %vm693_vm5, %v1867_v48, -inf }
 0x359   : > { %v1853_v57 = vpop.f32.mrf.mxu1 }
 0x35a   : > { %v921_v58 = vsel %vm693_vm5, %v1853_v57, -inf }
 0x35b   : > { %922 = vmax.xlane.f32.xlu0 %v921_v58 }
 0x35f   : > { %v1871_v59 = vpop.f32.mrf.mxu3 }
 0x360   : > { %v706_v8 = vsel %vm693_vm5, %v1871_v59, -inf }
 0x361   : > { %v1873_v52 = vpop.f32.mrf.mxu1 }
 0x362   : > { %1010 = vrot.lane.b32.xlu1 %v1804_v22, %s1628_s22  ;;  %v924_v2 = vsel %vm693_vm5, %v1873_v52, -inf }
 0x367   : > { %v1875_v60 = vpop.f32.mrf.mxu3 }
 0x368   : > { %v709_v0 = vsel %vm693_vm5, %v1875_v60, -inf }
 0x369   : > { %v1877_v62 = vpop.f32.mrf.mxu1 }
 0x36a   : > { %790 = vrot.lane.b32.xlu1 %v1798_v13, %s1629_s24  ;;  %v927_v9 = vsel %vm693_vm5, %v1877_v62, -inf }
 0x36b   : > { %1008 = vrot.lane.b32.xlu2 %v1798_v13, %s1628_s22 }
 0x36f   : > { %792 = vrot.lane.b32.xlu0 %v1804_v22, %s1629_s24  ;;  %v1879_v63 = vpop.f32.mrf.mxu3 }
 0x371   : > { %v1883_v1 = vpop.f32.mrf.mxu1 }
 0x372   : > { %788 = vrot.lane.b32.xlu1 %v1791_v61, %s1629_s24  ;;  %v930_v17 = vsel %vm693_vm5, %v1883_v1, -inf }
 0x377   : > { %v1889_v3 = vpop.f32.mrf.mxu3 }
 0x378   : > { %v715_v5 = vsel %vm693_vm5, %v1889_v3, -inf }
 0x379   : > { %v1891_v4 = vpop.f32.mrf.mxu1 }
 0x37a   : > { %1006 = vrot.lane.b32.xlu1 %v1791_v61, %s1628_s22  ;;  %v712_v61 = vsel %vm693_vm5, %v1879_v63, -inf  ;;  %v933_v7 = vsel %vm693_vm5, %v1891_v4, -inf }
 0x394   : > { %710 = vmax.xlane.f32.xlu2 %v709_v0 }
 0x399   : > { %925 = vmax.xlane.f32.xlu0 %v924_v2 }
 0x39c   : > { %713 = vmax.xlane.f32.xlu2 %v712_v61 }
 0x3a1   : > { %716 = vmax.xlane.f32.xlu0 %v715_v5 }
 0x3a4   : > { %704 = vmax.xlane.f32.xlu1 %v703_v6  ;;  %934 = vmax.xlane.f32.xlu2 %v933_v7 }
 0x3ac   : > { %707 = vmax.xlane.f32.xlu1 %v706_v8 }
 0x3b4   : > { %928 = vmax.xlane.f32.xlu1 %v927_v9  ;;  %v696_v10 = vpop.xlane.xlu0 %695 }
 0x3b5   : > { %v718_v11 = vsub.f32 %v673_v37, %v696_v10 }
 0x3b6   : > { %v914_v13 = vpop.xlane.xlu2 %913 }
 0x3b7   : > { %v726_v14 = vmul.f32 1.442695, %v718_v11  ;;  %v936_v15 = vsub.f32 %v892_v47, %v914_v13 }
 0x3b9   : > { %1527 = vpow2.f32 %v726_v14  ;;  %v944_v16 = vmul.f32 1.442695, %v936_v15 }
 0x3bb   : > { %1529 = vpow2.f32 %v944_v16 }
 0x3bc   : > { %931 = vmax.xlane.f32.xlu1 %v930_v17  ;;  %v699_v18 = vpop.xlane.xlu1 %698 }
 0x3bd   : > { %v719_v24 = vsub.f32 %v1837_v50, %v699_v18 }
 0x3be   : > { %v917_v19 = vpop.xlane.xlu2 %916 }
 0x3bf   : > { %v1905_v20 = vpop.eup %1527  ;;  %v937_v21 = vsub.f32 %v1841_v53, %v917_v19  ;;  %v728_v27 = vmul.f32 1.442695, %v719_v24 }
 0x3c0   : > { %v742_v22 = vsel %vm693_vm5, %v1905_v20, 0.0 }
 0x3c1   : > { %v1910_v23 = vpop.eup %1529  ;;  %v946_v25 = vmul.f32 1.442695, %v937_v21  ;;  %743 = vadd.xlane.f32.xlu2 %v742_v22 }
 0x3c2   : > { %v960_v26 = vsel %vm693_vm5, %v1910_v23, 0.0 }
 0x3c3   : > { %1531 = vpow2.f32 %v946_v25  ;;  %961 = vadd.xlane.f32.xlu0 %v960_v26 }
 0x3c4   : > { %v702_v28 = vpop.xlane.xlu0 %701  ;;  %1533 = vpow2.f32 %v728_v27 }
 0x3c5   : > { %v720_v47 = vsub.f32 %v1845_v43, %v702_v28 }
 0x3c6   : > { %v920_v31 = vpop.xlane.xlu2 %919 }
 0x3c7   : > { %v730_v49 = vmul.f32 1.442695, %v720_v47  ;;  %v938_v53 = vsub.f32 %v1849_v55, %v920_v31 }
 0x3c9   : > { %v1915_v29 = vpop.eup %1531  ;;  %v948_v39 = vmul.f32 1.442695, %v938_v53 }
 0x3ca   : > { %v963_v30 = vsel %vm693_vm5, %v1915_v29, 0.0  ;;  %v1919_v33 = vpop.eup %1533 }
 0x3cb   : > { %964 = vadd.xlane.f32.xlu2 %v963_v30  ;;  %v745_v36 = vsel %vm693_vm5, %v1919_v33, 0.0 }
 0x3ce   : > { %v923_v32 = vpop.xlane.xlu0 %922  ;;  %v1009_v41 = vpop.permute.xlu2 %1008 }
 0x3cf   : > { %v939_v34 = vsub.f32 %v1853_v57, %v923_v32 }
 0x3d1   : > { %v950_v35 = vmul.f32 1.442695, %v939_v34 }
 0x3d3   : > { %1535 = vpow2.f32 %v950_v35  ;;  %746 = vadd.xlane.f32.xlu2 %v745_v36 }
 0x3d4   : > { %v1011_v40 = vpop.permute.xlu1 %1010  ;;  %1537 = vpow2.f32 %v730_v49 }
 0x3d5   : > { %1032 = vmatpush.bf16.msrb.mxu2 %v1011_v40  ;;  %786 = vrot.lane.b32.xlu1 %v1796_v12, %s1629_s24  ;;  %1539 = vpow2.f32 %v948_v39 }
 0x3d9   : > { %v1926_v42 = vpop.eup %1535  ;;  %1033 = vmatpush.bf16.msrb.mxu2 %v1009_v41 }
 0x3da   : > { %v969_v44 = vsel %vm693_vm5, %v1926_v42, 0.0  ;;  %v1933_v50 = vpop.eup %1537 }
 0x3db   : > { %970 = vadd.xlane.f32.xlu0 %v969_v44  ;;  %v748_v51 = vsel %vm693_vm5, %v1933_v50, 0.0  ;;  %v1938_v56 = vpop.eup %1539 }
 0x3dc   : > { %v791_v45 = vpop.permute.xlu1 %790 }
 0x3e1   : > { %v793_v46 = vpop.permute.xlu0 %792 }
 0x3e2   : > { %814 = vmatpush.bf16.msra.mxu0 %v793_v46 }
 0x3e4   : > { %v789_v37 = vpop.permute.xlu1 %788 }
 0x3e6   : > { %815 = vmatpush.bf16.msra.mxu0 %v791_v45 }
 0x3ea   : > { %816 = vmatpush.bf16.msra.mxu0 %v789_v37 }
 0x3eb   : > { %1004 = vrot.lane.b32.xlu2 %v1796_v12, %s1628_s22  ;;  %v966_v12 = vsel %vm693_vm5, %v1938_v56, 0.0 }
 0x3ec   : > { %v1007_v38 = vpop.permute.xlu1 %1006 }
 0x3ed   : > { %1034 = vmatpush.bf16.msrb.mxu2 %v1007_v38 }
 0x3ff   : > { %749 = vadd.xlane.f32.xlu1 %v748_v51 }
 0x407   : > { %v711_v61 = vpop.xlane.xlu2 %710 }
 0x408   : > { %v723_v16 = vsub.f32 %v1875_v60, %v711_v61 }
 0x40c   : > { %v926_v54 = vpop.xlane.xlu0 %925 }
 0x40d   : > { %v940_v55 = vsub.f32 %v1873_v52, %v926_v54 }
 0x40f   : > { %v952_v6 = vmul.f32 1.442695, %v940_v55  ;;  %v714_v11 = vpop.xlane.xlu2 %713 }
 0x414   : > { %967 = vadd.xlane.f32.xlu2 %v966_v12  ;;  %v717_v43 = vpop.xlane.xlu0 %716 }
 0x415   : > { %v725_v57 = vsub.f32 %v1889_v3, %v717_v43 }
 0x417   : > { %v740_v58 = vmul.f32 1.442695, %v725_v57  ;;  %v705_v0 = vpop.xlane.xlu1 %704  ;;  %v935_v19 = vpop.xlane.xlu2 %934 }
 0x418   : > { %v721_v2 = vsub.f32 %v1867_v48, %v705_v0  ;;  %v943_v32 = vsub.f32 %v1891_v4, %v935_v19  ;;  %v1502_v19 = vld [vmem:[%s2176_s4] sm:$0xff] }
 0x419   : > { %1541 = vpow2.f32 %v740_v58  ;;  %1133 = vmatpush.bf16.msrb.mxu1 %v1502_v19  ;;  %1504 = vmatpush.bf16.msrb.mxu3 %v1502_v19 }
 0x41a   : > { %v732_v5 = vmul.f32 1.442695, %v721_v2  ;;  %v958_v35 = vmul.f32 1.442695, %v943_v32 }
 0x41c   : > { %1543 = vpow2.f32 %v732_v5 }
 0x41d   : > { %1545 = vpow2.f32 %v952_v6 }
 0x41f   : > { %v1945_v7 = vpop.eup %1541  ;;  %v708_v8 = vpop.xlane.xlu1 %707 }
 0x420   : > { %v763_v9 = vsel %vm693_vm5, %v1945_v7, 0.0  ;;  %v722_v3 = vsub.f32 %v1871_v59, %v708_v8  ;;  %v736_v59 = vmul.f32 1.442695, %v723_v16 }
 0x421   : > { %764 = vadd.xlane.f32.xlu2 %v763_v9 }
 0x422   : > { %v1949_v10 = vpop.eup %1543  ;;  %v734_v52 = vmul.f32 1.442695, %v722_v3 }
 0x423   : > { %v751_v48 = vsel %vm693_vm5, %v1949_v10, 0.0  ;;  %v1954_v14 = vpop.eup %1545 }
 0x424   : > { %752 = vadd.xlane.f32.xlu0 %v751_v48  ;;  %1547 = vpow2.f32 %v734_v52  ;;  %v972_v18 = vsel %vm693_vm5, %v1954_v14, 0.0 }
 0x427   : > { %v929_v13 = vpop.xlane.xlu1 %928 }
 0x428   : > { %v941_v15 = vsub.f32 %v1877_v62, %v929_v13  ;;  %v724_v62 = vsub.f32 %v1879_v63, %v714_v11 }
 0x42a   : > { %v954_v17 = vmul.f32 1.442695, %v941_v15  ;;  %v1960_v22 = vpop.eup %1547  ;;  %v738_v28 = vmul.f32 1.442695, %v724_v62 }
 0x42b   : > { %v754_v27 = vsel %vm693_vm5, %v1960_v22, 0.0 }
 0x42c   : > { %1549 = vpow2.f32 %v954_v17  ;;  %973 = vadd.xlane.f32.xlu0 %v972_v18 }
 0x42d   : > { %1551 = vpow2.f32 %v736_v59 }
 0x42f   : > { %v932_v21 = vpop.xlane.xlu1 %931 }
 0x430   : > { %v942_v24 = vsub.f32 %v1883_v1, %v932_v21 }
 0x432   : > { %v1963_v25 = vpop.eup %1549  ;;  %v956_v60 = vmul.f32 1.442695, %v942_v24 }
 0x433   : > { %v975_v26 = vsel %vm693_vm5, %v1963_v25, 0.0  ;;  %v1970_v31 = vpop.eup %1551 }
 0x434   : > { %1553 = vpow2.f32 %v956_v60  ;;  %976 = vadd.xlane.f32.xlu1 %v975_v26  ;;  %755 = vadd.xlane.f32.xlu0 %v754_v27  ;;  %v744_v30 = vpop.xlane.xlu2 %743  ;;  %v757_v34 = vsel %vm693_vm5, %v1970_v31, 0.0  ;;  %v1503_v60 = vld [vmem:[%s2176_s4 + $0x8] sm:$0xff] }
 0x435   : > { %1555 = vpow2.f32 %v738_v28 }
 0x436   : > { %1557 = vpow2.f32 %v958_v35  ;;  %v962_v41 = vpop.xlane.xlu0 %961 }
 0x43a   : > { %v1972_v1 = vpop.eup %1553 }
 0x43b   : > { %v978_v63 = vsel %vm693_vm5, %v1972_v1, 0.0  ;;  %v1979_v40 = vpop.eup %1555 }
 0x43c   : > { %979 = vadd.xlane.f32.xlu1 %v978_v63  ;;  %758 = vadd.xlane.f32.xlu0 %v757_v34  ;;  %v760_v44 = vsel %vm693_vm5, %v1979_v40, 0.0  ;;  %v1983_v46 = vpop.eup %1557 }
 0x43d   : > { %v981_v49 = vsel %vm693_vm5, %v1983_v46, 0.0 }
 0x43e   : > { %v965_v36 = vpop.xlane.xlu2 %964 }
 0x43f   : > { %1559 = vrcp.f32 %v965_v36 }
 0x440   : > { %1561 = vrcp.f32 %v744_v30 }
 0x441   : > { %1563 = vrcp.f32 %v962_v41 }
 0x444   : > { %761 = vadd.xlane.f32.xlu0 %v760_v44 }
 0x445   : > { %v1560_v37 = vpop.eup %1559 }
 0x446   : > { %v747_v4 = vpop.xlane.xlu2 %746  ;;  %v1562_v38 = vpop.eup %1561  ;;  %v993_v51 = vmul.f32 %v1560_v37, %v1915_v29 }
 0x447   : > { %1565 = vrcp.f32 %v747_v4  ;;  %v787_v45 = vpop.permute.xlu1 %786  ;;  %v1564_v47 = vpop.eup %1563  ;;  %v774_v12 = vmul.f32 %v1562_v38, %v1905_v20 }
 0x448   : > { %817 = vmatpush.bf16.msra.mxu0 %v787_v45  ;;  %v992_v39 = vmul.f32 %v1564_v47, %v1910_v23 }
 0x44a   : > { %v1000_v58 = vpack.c.bf16 %v993_v51, %v992_v39 }
 0x44c   : > { %982 = vadd.xlane.f32.xlu0 %v981_v49  ;;  %1086 = vmatpush.bf16.msrb.mxu0 %v1503_v60 }
 0x44d   : > { %v1566_v53 = vpop.eup %1565 }
 0x44e   : > { %v1005_v54 = vpop.permute.xlu2 %1004  ;;  %v775_v43 = vmul.f32 %v1566_v53, %v1919_v33  ;;  %v971_v0 = vpop.xlane.xlu0 %970 }
 0x44f   : > { %1035 = vmatpush.bf16.msrb.mxu2 %v1005_v54  ;;  %1567 = vrcp.f32 %v971_v0 }
 0x450   : > { %v782_v57 = vpack.c.bf16 %v775_v43, %v774_v12 }
 0x452   : > { %1468 = vmatmul.msk.bf16.vlgmr.msra.gmra.mxu0 %vm693_vm5, %v782_v57  ;;  %1476 = vmatmul.msk.bf16.vlgmr.msrb.gmra.mxu2 %vm693_vm5, %v1000_v58 }
 0x455   : > { %v1568_v29 = vpop.eup %1567 }
 0x456   : > { %v995_v55 = vmul.f32 %v1568_v29, %v1926_v42 }
 0x472   : > { %v750_v5 = vpop.xlane.xlu1 %749 }
 0x487   : > { %v968_v2 = vpop.xlane.xlu2 %967 }
 0x488   : > { %1569 = vrcp.f32 %v968_v2 }
 0x489   : > { %1571 = vrcp.f32 %v750_v5 }
 0x48e   : > { %v1570_v61 = vpop.eup %1569 }
 0x48f   : > { %v994_v23 = vmul.f32 %v1570_v61, %v1938_v56  ;;  %v1572_v6 = vpop.eup %1571 }
 0x490   : > { %v776_v3 = vmul.f32 %v1572_v6, %v1933_v50 }
 0x491   : > { %v1001_v20 = vpack.c.bf16 %v995_v55, %v994_v23  ;;  %v2028_v55 = vld [vmem:[%s2177_s5] ss:$0 sm:$0xff] }
 0x493   : > { %1477 = vmatmul.msk.bf16.gmra.mxu2 %vm693_vm5, %v1001_v20 }
 0x497   : > { %v753_v33 = vpop.xlane.xlu0 %752 }
 0x498   : > { %1573 = vrcp.f32 %v753_v33 }
 0x49e   : > { %v1574_v8 = vpop.eup %1573 }
 0x49f   : > { %v974_v9 = vpop.xlane.xlu0 %973  ;;  %v777_v48 = vmul.f32 %v1574_v8, %v1949_v10 }
 0x4a0   : > { %1575 = vrcp.f32 %v974_v9 }
 0x4a1   : > { %v783_v11 = vpack.c.bf16 %v777_v48, %v776_v3 }
 0x4a3   : > { %1469 = vmatmul.msk.bf16.gmra.mxu0 %vm693_vm5, %v783_v11 }
 0x4a6   : > { %v1576_v52 = vpop.eup %1575 }
 0x4a7   : > { %v977_v56 = vpop.xlane.xlu1 %976  ;;  %v756_v42 = vpop.xlane.xlu0 %755  ;;  %v996_v16 = vmul.f32 %v1576_v52, %v1954_v14 }
 0x4a8   : > { %1577 = vrcp.f32 %v977_v56 }
 0x4a9   : > { %1579 = vrcp.f32 %v756_v42 }
 0x4ae   : > { %v1578_v13 = vpop.eup %1577 }
 0x4af   : > { %v759_v15 = vpop.xlane.xlu0 %758  ;;  %v997_v17 = vmul.f32 %v1578_v13, %v1963_v25  ;;  %v1580_v50 = vpop.eup %1579 }
 0x4b0   : > { %1581 = vrcp.f32 %v759_v15  ;;  %v778_v21 = vmul.f32 %v1580_v50, %v1960_v22  ;;  %v980_v62 = vpop.xlane.xlu1 %979  ;;  %v765_v25 = vpop.xlane.xlu2 %764 }
 0x4b1   : > { %v1002_v18 = vpack.c.bf16 %v997_v17, %v996_v16 }
 0x4b3   : > { %1478 = vmatmul.msk.bf16.gmra.mxu2 %vm693_vm5, %v1002_v18 }
 0x4b6   : > { %v1582_v10 = vpop.eup %1581 }
 0x4b7   : > { %v762_v59 = vpop.xlane.xlu0 %761  ;;  %v779_v24 = vmul.f32 %v1582_v10, %v1970_v31 }
 0x4b8   : > { %1583 = vrcp.f32 %v762_v59  ;;  %v1630_v59 = vmov 32.0  }
 0x4b9   : > { %v784_v14 = vpack.c.bf16 %v779_v24, %v778_v21  ;;  %1585 = vrcp.f32 %v980_v62 }
 0x4ba   : > { %1587 = vrcp.f32 %v765_v25 }
 0x4bb   : > { %1470 = vmatmul.msk.bf16.gmra.mxu0 %vm693_vm5, %v784_v14 }
 0x4be   : > { %v1584_v22 = vpop.eup %1583 }
 0x4bf   : > { %v983_v26 = vpop.xlane.xlu0 %982  ;;  %v1586_v27 = vpop.eup %1585  ;;  %v780_v31 = vmul.f32 %v1584_v22, %v1979_v40 }
 0x4c0   : > { %1589 = vrcp.f32 %v983_v26  ;;  %v1588_v28 = vpop.eup %1587  ;;  %v998_v32 = vmul.f32 %v1586_v27, %v1972_v1 }
 0x4c1   : > { %v781_v34 = vmul.f32 %v1588_v28, %v1945_v7  ;;  %1591 = vrcp.f32 %v1630_v59 }
 0x4c3   : > { %v785_v36 = vpack.c.bf16 %v781_v34, %v780_v31 }
 0x4c6   : > { %v1590_v30 = vpop.eup %1589 }
 0x4c7   : > { %v999_v63 = vmul.f32 %v1590_v30, %v1983_v46  ;;  %v1592_v19 = vpop.eup %1591 }
 0x4c8   : > { %v1188_v24 = vmul.f32 32.0, %v1592_v19  ;;  %vm1192_vm6 = vweird.f32 %v1592_v19 }
 0x4c9   : > { %v1003_v35 = vpack.c.bf16 %v999_v63, %v998_v32 }
 0x4ca   : > { %v1189_v25 = vsub.f32 1.0, %v1188_v24 }
 0x4cb   : > { %1479 = vmatmul.msk.bf16.gmra.mxu2 %vm693_vm5, %v1003_v35  ;;  %1471 = vmatmul.msk.bf16.gmra.mxu0 %vm693_vm5, %v785_v36 }
 0x4cc   : > { %v1190_v22 = vmul.f32 %v1592_v19, %v1189_v25 }
 0x4ce   : > { %v1191_v31 = vadd.f32 %v1592_v19, %v1190_v22 }
 0x4cf   : > { %v819_v41 = vpop.f32.mrf.mxu0 }
 0x4d0   : > { %v2042_v34 = vsel %vm1192_vm6, %v1592_v19, %v1191_v31 }
 0x4d5   : > { %v1037_v44 = vpop.f32.mrf.mxu2 }
 0x4d7   : > { %v821_v4 = vpop.f32.mrf.mxu0 }
 0x4d8   : > { %v839_v45 = vpack.c.bf16 %v821_v4, %v819_v41 }
 0x4da   : > { %1492 = vmatmul.msk.bf16.vlgmr.msrb.gmra.mxu1 %vm639_vm4, %v839_v45 }
 0x4dd   : > { %v1039_v37 = vpop.f32.mrf.mxu2 }
 0x4de   : > { %v1057_v40 = vpack.c.bf16 %v1039_v37, %v1037_v44 }
 0x4e0   : > { %1484 = vmatmul.msk.bf16.vlgmr.msrb.gmra.mxu0 %vm639_vm4, %v1057_v40 }
 0x516   : > { %v1042_v1 = vpop.f32.mrf.mxu2 }
 0x51e   : > { %v1044_v46 = vpop.f32.mrf.mxu2 }
 0x51f   : > { %v1058_v38 = vpack.c.bf16 %v1044_v46, %v1042_v1 }
 0x520   : > { %v824_v7 = vpop.f32.mrf.mxu0 }
 0x521   : > { %1485 = vmatmul.msk.bf16.gmra.mxu0 %vm639_vm4, %v1058_v38 }
 0x528   : > { %v826_v47 = vpop.f32.mrf.mxu0 }
 0x529   : > { %v840_v49 = vpack.c.bf16 %v826_v47, %v824_v7 }
 0x52b   : > { %1493 = vmatmul.msk.bf16.vlgmr.msrb.gmra.mxu3 %vm639_vm4, %v840_v49 }
 0x536   : > { %v1047_v51 = vpop.f32.mrf.mxu2 }
 0x538   : > { %v829_v53 = vpop.f32.mrf.mxu0 }
 0x53e   : > { %v1049_v39 = vpop.f32.mrf.mxu2 }
 0x53f   : > { %v1059_v54 = vpack.c.bf16 %v1049_v39, %v1047_v51 }
 0x540   : > { %v831_v12 = vpop.f32.mrf.mxu0 }
 0x541   : > { %1486 = vmatmul.msk.bf16.gmra.mxu0 %vm639_vm4, %v1059_v54  ;;  %v841_v43 = vpack.c.bf16 %v831_v12, %v829_v53 }
 0x543   : > { %1494 = vmatmul.msk.bf16.gmra.mxu3 %vm639_vm4, %v841_v43 }
 0x548   : > { %v834_v57 = vpop.f32.mrf.mxu0 }
 0x54e   : > { %v1052_v58 = vpop.f32.mrf.mxu2 }
 0x550   : > { %v836_v0 = vpop.f32.mrf.mxu0 }
 0x551   : > { %v842_v2 = vpack.c.bf16 %v836_v0, %v834_v57 }
 0x553   : > { %1495 = vmatmul.msk.bf16.gmra.mxu3 %vm639_vm4, %v842_v2 }
 0x556   : > { %v1054_v29 = vpop.f32.mrf.mxu2 }
 0x557   : > { %v1060_v61 = vpack.c.bf16 %v1054_v29, %v1052_v58  ;;  %v1135_v23 = vpop.f32.mrf.mxu1 }
 0x559   : > { %1487 = vmatmul.msk.bf16.gmra.mxu0 %vm639_vm4, %v1060_v61 }
 0x55d   : > { %v1088_v20 = vpop.f32.mrf.mxu0 }
 0x55e   : > { %v1136_v5 = vadd.f32 %v1135_v23, %v1088_v20 }
 0x55f   : > { %v1137_v8 = vpop.f32.mrf.mxu1 }
 0x560   : > { %v1155_v33 = vadd.f32 %v2028_v55, %v1136_v5 }
 0x562   : > { %v1163_v6 = vsel %vm373_vm0, %v1155_v33, 0.0 }
 0x563   : > { %1164 = vadd.xlane.f32.xlu2 %v1163_v6 }
 0x565   : > { %v1090_v9 = vpop.f32.mrf.mxu0 }
 0x566   : > { %v1138_v3 = vadd.f32 %v1137_v8, %v1090_v9 }
 0x568   : > { %v1156_v48 = vadd.f32 %v2028_v55, %v1138_v3 }
 0x56a   : > { %v1166_v11 = vsel %vm373_vm0, %v1156_v48, 0.0 }
 0x56b   : > { %1167 = vadd.xlane.f32.xlu1 %v1166_v11 }
 0x59e   : > { %v1093_v56 = vpop.f32.mrf.mxu0 }
 0x5a6   : > { %v1095_v16 = vpop.f32.mrf.mxu0 }
 0x5ae   : > { %v1140_v42 = vpop.f32.mrf.mxu3 }
 0x5af   : > { %v1141_v52 = vadd.f32 %v1140_v42, %v1093_v56 }
 0x5b1   : > { %v1157_v13 = vadd.f32 %v2028_v55, %v1141_v52 }
 0x5b3   : > { %v1169_v15 = vsel %vm373_vm0, %v1157_v13, 0.0 }
 0x5b4   : > { %1170 = vadd.xlane.f32.xlu0 %v1169_v15 }
 0x5b6   : > { %v1142_v17 = vpop.f32.mrf.mxu3 }
 0x5b7   : > { %v1143_v18 = vadd.f32 %v1142_v17, %v1095_v16 }
 0x5b9   : > { %v1158_v50 = vadd.f32 %v2028_v55, %v1143_v18 }
 0x5bb   : > { %v1172_v10 = vsel %vm373_vm0, %v1158_v50, 0.0 }
 0x5bc   : > { %1173 = vadd.xlane.f32.xlu2 %v1172_v10 }
 0x5be   : > { %v1098_v21 = vpop.f32.mrf.mxu0 }
 0x5c6   : > { %v1145_v14 = vpop.f32.mrf.mxu3  ;;  %v1100_v27 = vpop.f32.mrf.mxu0 }
 0x5c7   : > { %v1146_v62 = vadd.f32 %v1145_v14, %v1098_v21 }
 0x5c9   : > { %v1159_v60 = vadd.f32 %v2028_v55, %v1146_v62 }
 0x5cb   : > { %v1175_v26 = vsel %vm373_vm0, %v1159_v60, 0.0 }
 0x5cc   : > { %1176 = vadd.xlane.f32.xlu1 %v1175_v26 }
 0x5ce   : > { %v1147_v28 = vpop.f32.mrf.mxu3 }
 0x5cf   : > { %v1148_v30 = vadd.f32 %v1147_v28, %v1100_v27 }
 0x5d1   : > { %v1160_v32 = vadd.f32 %v2028_v55, %v1148_v30 }
 0x5d3   : > { %v1178_v63 = vsel %vm373_vm0, %v1160_v32, 0.0 }
 0x5d4   : > { %1179 = vadd.xlane.f32.xlu0 %v1178_v63 }
 0x5d6   : > { %v1165_v35 = vpop.xlane.xlu2 %1164  ;;  %v1103_v36 = vpop.f32.mrf.mxu0 }
 0x5d7   : > { %v1194_v41 = vmul.f32 %v2042_v34, %v1165_v35  ;;  %v1150_v44 = vpop.f32.mrf.mxu3 }
 0x5d8   : > { %v1151_v4 = vadd.f32 %v1150_v44, %v1103_v36  ;;  %v2101_v36 = vld [vmem:[%s2180_s8] ss:$0 sm:$0xff] }
 0x5d9   : > { %v2045_v45 = vsub.f32 %v1155_v33, %v1194_v41 }
 0x5da   : > { %v1161_v37 = vadd.f32 %v2028_v55, %v1151_v4  ;;  %v2106_v4 = vld [vmem:[%s2181_s9] ss:$0 sm:$0xff] }
 0x5db   : > { %v1210_v40 = vmul.f32 %v2045_v45, %v2045_v45 }
 0x5dc   : > { %v1181_v1 = vsel %vm373_vm0, %v1161_v37, 0.0 }
 0x5dd   : > { %1182 = vadd.xlane.f32.xlu2 %v1181_v1  ;;  %v1218_v46 = vsel %vm373_vm0, %v1210_v40, 0.0 }
 0x5de   : > { %v1168_v38 = vpop.xlane.xlu1 %1167  ;;  %1219 = vadd.xlane.f32.xlu0 %v1218_v46  ;;  %v1105_v7 = vpop.f32.mrf.mxu0 }
 0x5df   : > { %v1195_v47 = vmul.f32 %v2042_v34, %v1168_v38  ;;  %v1152_v49 = vpop.f32.mrf.mxu3 }
 0x5e0   : > { %v1153_v51 = vadd.f32 %v1152_v49, %v1105_v7 }
 0x5e1   : > { %v2053_v53 = vsub.f32 %v1156_v48, %v1195_v47  ;;  %v1609_v47 = vld [vmem:[%s1714_s26] sm:$0xff] }
 0x5e2   : > { %v1162_v39 = vadd.f32 %v2028_v55, %v1153_v51 }
 0x5e3   : > { %v1211_v54 = vmul.f32 %v2053_v53, %v2053_v53 }
 0x5e4   : > { %v1184_v12 = vsel %vm373_vm0, %v1162_v39, 0.0 }
 0x5e5   : > { %1185 = vadd.xlane.f32.xlu1 %v1184_v12  ;;  %v1221_v43 = vsel %vm373_vm0, %v1211_v54, 0.0 }
 0x5e6   : > { %1222 = vadd.xlane.f32.xlu2 %v1221_v43  ;;  %v1610_v43 = vld [vmem:[%s1714_s26 + $0x8] sm:$0xff] }
 0x627   : > { %v1171_v57 = vpop.xlane.xlu0 %1170 }
 0x628   : > { %v1196_v58 = vmul.f32 %v2042_v34, %v1171_v57 }
 0x62a   : > { %v2061_v0 = vsub.f32 %v1157_v13, %v1196_v58 }
 0x62c   : > { %v1212_v2 = vmul.f32 %v2061_v0, %v2061_v0 }
 0x62e   : > { %v1224_v29 = vsel %vm373_vm0, %v1212_v2, 0.0 }
 0x62f   : > { %v1174_v61 = vpop.xlane.xlu2 %1173  ;;  %1225 = vadd.xlane.f32.xlu1 %v1224_v29 }
 0x630   : > { %v1197_v23 = vmul.f32 %v2042_v34, %v1174_v61 }
 0x632   : > { %v2067_v55 = vsub.f32 %v1158_v50, %v1197_v23 }
 0x634   : > { %v1213_v20 = vmul.f32 %v2067_v55, %v2067_v55 }
 0x636   : > { %v1227_v5 = vsel %vm373_vm0, %v1213_v20, 0.0 }
 0x637   : > { %1228 = vadd.xlane.f32.xlu0 %v1227_v5 }
 0x63f   : > { %v1177_v33 = vpop.xlane.xlu1 %1176 }
 0x640   : > { %v1198_v6 = vmul.f32 %v2042_v34, %v1177_v33 }
 0x642   : > { %v2073_v8 = vsub.f32 %v1159_v60, %v1198_v6 }
 0x644   : > { %v1214_v9 = vmul.f32 %v2073_v8, %v2073_v8 }
 0x646   : > { %v1230_v3 = vsel %vm373_vm0, %v1214_v9, 0.0 }
 0x647   : > { %1231 = vadd.xlane.f32.xlu2 %v1230_v3  ;;  %v1180_v48 = vpop.xlane.xlu0 %1179 }
 0x648   : > { %v1199_v11 = vmul.f32 %v2042_v34, %v1180_v48 }
 0x64a   : > { %v2079_v56 = vsub.f32 %v1160_v32, %v1199_v11 }
 0x64c   : > { %v1215_v42 = vmul.f32 %v2079_v56, %v2079_v56 }
 0x64e   : > { %v1233_v52 = vsel %vm373_vm0, %v1215_v42, 0.0 }
 0x64f   : > { %1234 = vadd.xlane.f32.xlu1 %v1233_v52 }
 0x650   : > { %v1183_v13 = vpop.xlane.xlu2 %1182 }
 0x651   : > { %v1200_v15 = vmul.f32 %v2042_v34, %v1183_v13  ;;  %v1220_v16 = vpop.xlane.xlu0 %1219 }
 0x652   : > { %v1242_v17 = vmul.f32 %v1220_v16, %v2042_v34 }
 0x653   : > { %v2086_v18 = vsub.f32 %v1161_v37, %v1200_v15 }
 0x654   : > { %v1250_v50 = vadd.f32 1e-05, %v1242_v17 }
 0x655   : > { %v1216_v10 = vmul.f32 %v2086_v18, %v2086_v18 }
 0x656   : > { %1593 = vrsqrt.f32 %v1250_v50  ;;  %vm1264_vm8 = vweird.f32 %v1250_v50 }
 0x657   : > { %v1236_v59 = vsel %vm373_vm0, %v1216_v10, 0.0 }
 0x658   : > { %1237 = vadd.xlane.f32.xlu0 %v1236_v59  ;;  %v1186_v19 = vpop.xlane.xlu1 %1185 }
 0x659   : > { %v1201_v21 = vmul.f32 %v2042_v34, %v1186_v19  ;;  %v1223_v24 = vpop.xlane.xlu2 %1222 }
 0x65a   : > { %v1243_v14 = vmul.f32 %v1223_v24, %v2042_v34 }
 0x65b   : > { %v2093_v62 = vsub.f32 %v1162_v39, %v1201_v21 }
 0x65c   : > { %v1594_v25 = vpop.eup %1593  ;;  %v1251_v60 = vadd.f32 1e-05, %v1243_v14  ;;  %v1611_v14 = vld [vmem:[%s1714_s26 + $0x10] sm:$0xff] }
 0x65d   : > { %v1259_v26 = vmul.f32 %v1594_v25, %v1250_v50  ;;  %v1217_v22 = vmul.f32 %v2093_v62, %v2093_v62  ;;  %vm1265_vm7 = vweird.f32 %v1594_v25 }
 0x65e   : > { %1595 = vrsqrt.f32 %v1251_v60  ;;  %vm1266_vm9 = vmor %vm1264_vm8, %vm1265_vm7  ;;  %vm1274_vm11 = vweird.f32 %v1251_v60 }
 0x65f   : > { %v1260_v27 = vmul.f32 %v1594_v25, %v1259_v26  ;;  %v1239_v28 = vsel %vm373_vm0, %v1217_v22, 0.0 }
 0x660   : > { %1240 = vadd.xlane.f32.xlu2 %v1239_v28 }
 0x661   : > { %v1261_v30 = vmul.f32 0.5, %v1260_v27 }
 0x663   : > { %v1262_v31 = vsub.f32 1.5, %v1261_v30 }
 0x664   : > { %v1596_v32 = vpop.eup %1595 }
 0x665   : > { %v1263_v63 = vmul.f32 %v1594_v25, %v1262_v31  ;;  %v1269_v35 = vmul.f32 %v1596_v32, %v1251_v60  ;;  %vm1275_vm10 = vweird.f32 %v1596_v32 }
 0x666   : > { %vm1276_vm12 = vmor %vm1274_vm11, %vm1275_vm10 }
 0x667   : > { %v1267_v41 = vsel %vm1266_vm9, %v1594_v25, %v1263_v63  ;;  %v1270_v44 = vmul.f32 %v1596_v32, %v1269_v35  ;;  %v1612_v63 = vld [vmem:[%s1714_s26 + $0x18] sm:$0xff] }
 0x668   : > { %v1338_v37 = vmul.f32 %v1267_v41, %v2045_v45 }
 0x669   : > { %v1271_v40 = vmul.f32 0.5, %v1270_v44 }
 0x66a   : > { %v1346_v1 = vmul.f32 %v2101_v36, %v1338_v37 }
 0x66b   : > { %v1272_v46 = vsub.f32 1.5, %v1271_v40 }
 0x66c   : > { %v1354_v38 = vadd.f32 %v2106_v4, %v1346_v1 }
 0x66d   : > { %v1273_v7 = vmul.f32 %v1596_v32, %v1272_v46 }
 0x66e   : > { %v1362_v49 = vadd.f32 %v1609_v47, %v1354_v38 }
 0x66f   : > { %v1277_v45 = vsel %vm1276_vm12, %v1596_v32, %v1273_v7 }
 0x670   : > { %v1370_v51 = vmul.f32 0.5, %v1362_v49  ;;  %v1339_v39 = vmul.f32 %v1277_v45, %v2053_v53 }
 0x672   : > { %1378 = vst.msk [vmem:[%s2117_s20] sm:$0xff] %vm373_vm0, %v1370_v51  ;;  %v1347_v54 = vmul.f32 %v2101_v36, %v1339_v39 }
 0x674   : > { %v1355_v12 = vadd.f32 %v2106_v4, %v1347_v54 }
 0x676   : > { %v1363_v57 = vadd.f32 %v1610_v43, %v1355_v12 }
 0x678   : > { %v1371_v58 = vmul.f32 0.5, %v1363_v57 }
 0x67a   : > { %1379 = vst.msk [vmem:[%s2117_s20 + $0x8] sm:$0xff] %vm373_vm0, %v1371_v58 }
 0x6a2   : > { %v1226_v2 = vpop.xlane.xlu1 %1225 }
 0x6a3   : > { %v1244_v29 = vmul.f32 %v1226_v2, %v2042_v34 }
 0x6a5   : > { %v1252_v61 = vadd.f32 1e-05, %v1244_v29 }
 0x6a7   : > { %1597 = vrsqrt.f32 %v1252_v61  ;;  %vm1284_vm14 = vweird.f32 %v1252_v61 }
 0x6aa   : > { %v1229_v23 = vpop.xlane.xlu0 %1228 }
 0x6ab   : > { %v1245_v20 = vmul.f32 %v1229_v23, %v2042_v34 }
 0x6ad   : > { %v1598_v53 = vpop.eup %1597  ;;  %v1253_v5 = vadd.f32 1e-05, %v1245_v20 }
 0x6ae   : > { %v1279_v33 = vmul.f32 %v1598_v53, %v1252_v61  ;;  %vm1285_vm13 = vweird.f32 %v1598_v53 }
 0x6af   : > { %1599 = vrsqrt.f32 %v1253_v5  ;;  %vm1286_vm15 = vmor %vm1284_vm14, %vm1285_vm13  ;;  %vm1294_vm2 = vweird.f32 %v1253_v5 }
 0x6b0   : > { %v1280_v6 = vmul.f32 %v1598_v53, %v1279_v33 }
 0x6b2   : > { %v1281_v9 = vmul.f32 0.5, %v1280_v6 }
 0x6b4   : > { %v1282_v3 = vsub.f32 1.5, %v1281_v9 }
 0x6b5   : > { %v1600_v48 = vpop.eup %1599 }
 0x6b6   : > { %v1283_v11 = vmul.f32 %v1598_v53, %v1282_v3  ;;  %v1289_v42 = vmul.f32 %v1600_v48, %v1253_v5  ;;  %vm1295_vm1 = vweird.f32 %v1600_v48 }
 0x6b7   : > { %vm1296_vm3 = vmor %vm1294_vm2, %vm1295_vm1 }
 0x6b8   : > { %v1287_v52 = vsel %vm1286_vm15, %v1598_v53, %v1283_v11  ;;  %v1290_v13 = vmul.f32 %v1600_v48, %v1289_v42  ;;  %v1613_v53 = vld [vmem:[%s1714_s26 + $0x20] sm:$0xff] }
 0x6b9   : > { %v1340_v15 = vmul.f32 %v1287_v52, %v2061_v0 }
 0x6ba   : > { %v1291_v16 = vmul.f32 0.5, %v1290_v13  ;;  %v1232_v50 = vpop.xlane.xlu2 %1231 }
 0x6bb   : > { %v1348_v17 = vmul.f32 %v2101_v36, %v1340_v15  ;;  %v1246_v59 = vmul.f32 %v1232_v50, %v2042_v34  ;;  %v1614_v15 = vld [vmem:[%s1714_s26 + $0x28] sm:$0xff] }
 0x6bc   : > { %v1292_v10 = vsub.f32 1.5, %v1291_v16 }
 0x6bd   : > { %v1356_v19 = vadd.f32 %v2106_v4, %v1348_v17  ;;  %v1254_v24 = vadd.f32 1e-05, %v1246_v59 }
 0x6be   : > { %v1293_v21 = vmul.f32 %v1600_v48, %v1292_v10 }
 0x6bf   : > { %v1364_v25 = vadd.f32 %v1611_v14, %v1356_v19  ;;  %1601 = vrsqrt.f32 %v1254_v24  ;;  %vm1304_vm5 = vweird.f32 %v1254_v24 }
 0x6c0   : > { %v1297_v60 = vsel %vm1296_vm3, %v1600_v48, %v1293_v21 }
 0x6c1   : > { %v1372_v0 = vmul.f32 0.5, %v1364_v25  ;;  %v1341_v26 = vmul.f32 %v1297_v60, %v2067_v55  ;;  %v1615_v25 = vld [vmem:[%s1714_s26 + $0x30] sm:$0xff] }
 0x6c2   : > { %v1235_v27 = vpop.xlane.xlu1 %1234 }
 0x6c3   : > { %1380 = vst.msk [vmem:[%s2117_s20 + $0x10] sm:$0xff] %vm373_vm0, %v1372_v0  ;;  %v1349_v22 = vmul.f32 %v2101_v36, %v1341_v26  ;;  %v1247_v28 = vmul.f32 %v1235_v27, %v2042_v34 }
 0x6c5   : > { %v1357_v30 = vadd.f32 %v2106_v4, %v1349_v22  ;;  %v1602_v31 = vpop.eup %1601  ;;  %v1255_v32 = vadd.f32 1e-05, %v1247_v28  ;;  %v1616_v28 = vld [vmem:[%s1714_s26 + $0x38] sm:$0xff] }
 0x6c6   : > { %v1299_v41 = vmul.f32 %v1602_v31, %v1254_v24  ;;  %vm1305_vm4 = vweird.f32 %v1602_v31 }
 0x6c7   : > { %v1365_v35 = vadd.f32 %v1612_v63, %v1357_v30  ;;  %1603 = vrsqrt.f32 %v1255_v32  ;;  %vm1306_vm6 = vmor %vm1304_vm5, %vm1305_vm4  ;;  %vm1314_vm8 = vweird.f32 %v1255_v32 }
 0x6c8   : > { %v1300_v37 = vmul.f32 %v1602_v31, %v1299_v41 }
 0x6c9   : > { %v1373_v44 = vmul.f32 0.5, %v1365_v35 }
 0x6ca   : > { %v1301_v55 = vmul.f32 0.5, %v1300_v37 }
 0x6cb   : > { %1381 = vst.msk [vmem:[%s2117_s20 + $0x18] sm:$0xff] %vm373_vm0, %v1373_v44  ;;  %v1238_v40 = vpop.xlane.xlu0 %1237 }
 0x6cc   : > { %v1248_v1 = vmul.f32 %v1238_v40, %v2042_v34  ;;  %v1302_v46 = vsub.f32 1.5, %v1301_v55 }
 0x6cd   : > { %v1604_v38 = vpop.eup %1603 }
 0x6ce   : > { %v1256_v7 = vadd.f32 1e-05, %v1248_v1  ;;  %v1303_v47 = vmul.f32 %v1602_v31, %v1302_v46  ;;  %v1309_v49 = vmul.f32 %v1604_v38, %v1255_v32  ;;  %vm1315_vm7 = vweird.f32 %v1604_v38 }
 0x6cf   : > { %vm1316_vm9 = vmor %vm1314_vm8, %vm1315_vm7 }
 0x6d0   : > { %1605 = vrsqrt.f32 %v1256_v7  ;;  %v1307_v45 = vsel %vm1306_vm6, %v1602_v31, %v1303_v47  ;;  %v1310_v51 = vmul.f32 %v1604_v38, %v1309_v49  ;;  %vm1324_vm11 = vweird.f32 %v1256_v7 }
 0x6d1   : > { %v1342_v39 = vmul.f32 %v1307_v45, %v2073_v8 }
 0x6d2   : > { %v1311_v54 = vmul.f32 0.5, %v1310_v51 }
 0x6d3   : > { %v1241_v12 = vpop.xlane.xlu2 %1240  ;;  %v1350_v43 = vmul.f32 %v2101_v36, %v1342_v39 }
 0x6d4   : > { %v1249_v57 = vmul.f32 %v1241_v12, %v2042_v34  ;;  %v1312_v58 = vsub.f32 1.5, %v1311_v54 }
 0x6d5   : > { %v1358_v29 = vadd.f32 %v2106_v4, %v1350_v43 }
 0x6d6   : > { %v1606_v2 = vpop.eup %1605  ;;  %v1257_v61 = vadd.f32 1e-05, %v1249_v57  ;;  %v1313_v23 = vmul.f32 %v1604_v38, %v1312_v58 }
 0x6d7   : > { %v1319_v20 = vmul.f32 %v1606_v2, %v1256_v7  ;;  %v1366_v5 = vadd.f32 %v1613_v53, %v1358_v29  ;;  %vm1325_vm10 = vweird.f32 %v1606_v2 }
 0x6d8   : > { %1607 = vrsqrt.f32 %v1257_v61  ;;  %v1317_v8 = vsel %vm1316_vm9, %v1604_v38, %v1313_v23  ;;  %vm1326_vm12 = vmor %vm1324_vm11, %vm1325_vm10  ;;  %vm1334_vm14 = vweird.f32 %v1257_v61 }
 0x6d9   : > { %v1320_v33 = vmul.f32 %v1606_v2, %v1319_v20  ;;  %v1374_v6 = vmul.f32 0.5, %v1366_v5  ;;  %v1343_v34 = vmul.f32 %v1317_v8, %v2079_v56 }
 0x6db   : > { %v1321_v9 = vmul.f32 0.5, %v1320_v33  ;;  %1382 = vst.msk [vmem:[%s2117_s20 + $0x20] sm:$0xff] %vm373_vm0, %v1374_v6  ;;  %v1351_v3 = vmul.f32 %v2101_v36, %v1343_v34 }
 0x6dd   : > { %v1322_v48 = vsub.f32 1.5, %v1321_v9  ;;  %v1359_v42 = vadd.f32 %v2106_v4, %v1351_v3 }
 0x6de   : > { %v1608_v11 = vpop.eup %1607 }
 0x6df   : > { %v1323_v52 = vmul.f32 %v1606_v2, %v1322_v48  ;;  %v1329_v13 = vmul.f32 %v1608_v11, %v1257_v61  ;;  %v1367_v16 = vadd.f32 %v1614_v15, %v1359_v42  ;;  %vm1335_vm13 = vweird.f32 %v1608_v11 }
 0x6e0   : > { %vm1336_vm15 = vmor %vm1334_vm14, %vm1335_vm13 }
 0x6e1   : > { %v1327_v17 = vsel %vm1326_vm12, %v1606_v2, %v1323_v52  ;;  %v1330_v56 = vmul.f32 %v1608_v11, %v1329_v13  ;;  %v1375_v50 = vmul.f32 0.5, %v1367_v16 }
 0x6e2   : > { %v1344_v10 = vmul.f32 %v1327_v17, %v2086_v18 }
 0x6e3   : > { %v1331_v59 = vmul.f32 0.5, %v1330_v56  ;;  %1383 = vst.msk [vmem:[%s2117_s20 + $0x28] sm:$0xff] %vm373_vm0, %v1375_v50 }
 0x6e4   : > { %v1352_v19 = vmul.f32 %v2101_v36, %v1344_v10 }
 0x6e5   : > { %v1332_v21 = vsub.f32 1.5, %v1331_v59 }
 0x6e6   : > { %v1360_v24 = vadd.f32 %v2106_v4, %v1352_v19 }
 0x6e7   : > { %v1333_v14 = vmul.f32 %v1608_v11, %v1332_v21 }
 0x6e8   : > { %v1368_v60 = vadd.f32 %v1615_v25, %v1360_v24 }
 0x6e9   : > { %v1337_v0 = vsel %vm1336_vm15, %v1608_v11, %v1333_v14 }
 0x6ea   : > { %v1376_v26 = vmul.f32 0.5, %v1368_v60  ;;  %v1345_v18 = vmul.f32 %v1337_v0, %v2093_v62 }
 0x6ec   : > { %1384 = vst.msk [vmem:[%s2117_s20 + $0x30] sm:$0xff] %vm373_vm0, %v1376_v26  ;;  %v1353_v22 = vmul.f32 %v2101_v36, %v1345_v18 }
 0x6ee   : > { %v1361_v27 = vadd.f32 %v2106_v4, %v1353_v22 }
 0x6f0   : > { %v1369_v30 = vadd.f32 %v1616_v28, %v1361_v27 }
 0x6f2   : > { %v1377_v31 = vmul.f32 0.5, %v1369_v30 }
 0x6f4   : > { %1385 = vst.msk [vmem:[%s2117_s20 + $0x38] sm:$0xff] %vm373_vm0, %v1377_v31 }
 0x6f5 PF: > { %s20_s13 = sadd.s32 1, %s1623_s13  }
 0x6f6   : > { %p17_p4 = scmp.ge.s32.totalorder %s20_s13, 4  }
 0x6f8   :  { %19 = sbr.rel (!%p17_p4) target bundleno = 1 (0x1), region = 90 }

</bundles_post_ra>
